<compile_context>
chip_gen: v7x
topology: tpu7x:2x2x1
jax: 0.10.0
libtpu: 0.0.40
codegen_flags: <defaults>
</compile_context>

<pallas_src>
import jax
import jax.numpy as jnp
from jax import lax
from jax.experimental import pallas as pl
from jax.experimental.pallas import tpu as pltpu


def _round_up(x, m):
    return ((x + m - 1) // m) * m


def _pick_tile(dim, target, align):
    """Largest multiple of `align` that divides `dim` and is <= `target`.
    Falls back to the full dim (always legal as a block size)."""
    if dim <= target:
        return dim
    best = None
    t = align
    while t <= target:
        if dim % t == 0:
            best = t
        t += align
    return best if best is not None else dim


def _layer3_kernel(x_ref, w_ref, b_ref, skip_ref, o_ref, acc_ref):
    # grid = (M, N, K); K (reduction) is innermost / last.
    # x_ref:    (tm, tk)   activation tile
    # w_ref:    (tn, tk)   weight tile, PyTorch [out_features, in_features] layout
    # b_ref:    (1,  tn)   bias tile
    # skip_ref: (tm, tn)   skip-connection tile (resident across K)
    # o_ref:    (tm, tn)   output tile (resident across K)
    # acc_ref:  (tm, tn)   f32 accumulator scratch
    k = pl.program_id(2)

    @pl.when(k == 0)
    def _init():
        acc_ref[...] = jnp.zeros_like(acc_ref)

    # Contract dim 1 of both operands => x @ W.T on the MXU without ever
    # materializing a transposed weight copy in HBM.
    acc_ref[...] += lax.dot_general(
        x_ref[...],
        w_ref[...],
        dimension_numbers=(((1,), (1,)), ((), ())),
        preferred_element_type=jnp.float32,
    )

    @pl.when(k == pl.num_programs(2) - 1)
    def _finalize():
        res = (acc_ref[...]
               + b_ref[...].astype(jnp.float32)
               + skip_ref[...].astype(jnp.float32))
        o_ref[...] = res.astype(o_ref.dtype)


def layer3_forward(x, weight, bias, skip, *, tm=256, tn=256, tk=512):
    """y = x @ weight.T + bias + skip  (PyTorch nn.Linear convention).

    x:      [B, H]
    weight: [H, H]   (PyTorch layout: [out_features, in_features])
    bias:   [H]
    skip:   [B, H]
    """
    B, H = x.shape
    assert weight.shape == (H, H), weight.shape
    assert bias.shape == (H,), bias.shape
    assert skip.shape == (B, H), skip.shape

    out_dtype = x.dtype

    # ---- tile selection (ragged-batch safe) --------------------------------
    tm_eff = min(tm, _round_up(B, 8))
    pad_b = _round_up(B, tm_eff) - B
    if pad_b:
        x = jnp.pad(x, ((0, pad_b), (0, 0)))
        skip = jnp.pad(skip, ((0, pad_b), (0, 0)))
    Bp = B + pad_b

    tn_eff = _pick_tile(H, tn, 128)
    tk_eff = _pick_tile(H, tk, 128)

    grid = (Bp // tm_eff, H // tn_eff, H // tk_eff)

    bias2d = bias.reshape(1, H)

    # ---- VMEM budget / cost hints ------------------------------------------
    x_sz, w_sz = x.dtype.itemsize, weight.dtype.itemsize
    b_sz, s_sz, o_sz = bias.dtype.itemsize, skip.dtype.itemsize, jnp.dtype(out_dtype).itemsize
    vmem_est = (2 * (tm_eff * tk_eff * x_sz        # x tiles (double-buffered)
                     + tn_eff * tk_eff * w_sz      # weight tiles
                     + tn_eff * b_sz               # bias tile
                     + tm_eff * tn_eff * s_sz      # skip tile
                     + tm_eff * tn_eff * o_sz)     # output tile
                + tm_eff * tn_eff * 4)             # f32 accumulator
    # Headroom, but stay under v7x's 64 MiB physical VMEM.
    vmem_limit = int(min(max(vmem_est * 3 // 2 + (4 << 20), 16 << 20), 64 << 20))

    cost = pl.CostEstimate(
        flops=2 * Bp * H * H,
        transcendentals=0,
        bytes_accessed=(Bp * H * x_sz + H * H * w_sz + H * b_sz
                        + Bp * H * s_sz + Bp * H * o_sz),
    )

    # skip is dead after this layer -> reuse its HBM buffer for the output.
    aliases = {3: 0} if skip.dtype == jnp.dtype(out_dtype) else {}

    out = pl.pallas_call(
        _layer3_kernel,
        out_shape=jax.ShapeDtypeStruct((Bp, H), out_dtype),
        grid_spec=pltpu.PrefetchScalarGridSpec(
            num_scalar_prefetch=0,
            grid=grid,
            in_specs=[
                pl.BlockSpec((tm_eff, tk_eff), lambda i, j, k: (i, k)),  # x
                pl.BlockSpec((tn_eff, tk_eff), lambda i, j, k: (j, k)),  # W [out,in]
                pl.BlockSpec((1, tn_eff), lambda i, j, k: (0, j)),       # bias
                pl.BlockSpec((tm_eff, tn_eff), lambda i, j, k: (i, j)),  # skip
            ],
            out_specs=pl.BlockSpec((tm_eff, tn_eff), lambda i, j, k: (i, j)),
            scratch_shapes=[pltpu.VMEM((tm_eff, tn_eff), jnp.float32)],
        ),
        compiler_params=pltpu.CompilerParams(
            dimension_semantics=("parallel", "parallel", "arbitrary"),
            vmem_limit_bytes=vmem_limit,
        ),
        cost_estimate=cost,
        input_output_aliases=aliases,
    )(x, weight, bias2d, skip)

    if pad_b:
        out = out[:B]
    return out


if __name__ == "__main__":
    key = jax.random.PRNGKey(0)
    k_x, k_w, k_b, k_s = jax.random.split(key, 4)

    # Small but MXU-friendly, lane-dense shapes exercising the full tiled path
    # (2 M-tiles x 2 N-tiles x 2 K-tiles with tm=tn=tk=256).
    batch, hidden = 512, 512
    x = jax.random.normal(k_x, (batch, hidden), dtype=jnp.float32)
    weight = jax.random.normal(k_w, (hidden, hidden), dtype=jnp.float32) * 0.05
    bias = jax.random.normal(k_b, (hidden,), dtype=jnp.float32) * 0.05
    skip = jax.random.normal(k_s, (batch, hidden), dtype=jnp.float32)

    # High-precision reference, computed before any aliased calls.
    ref = jnp.dot(x, weight.T, precision=lax.Precision.HIGHEST) + bias + skip

    # f32 path.
    out = layer3_forward(x, weight, bias, skip, tm=256, tn=256, tk=256)
    jax.block_until_ready(out)
    assert jnp.allclose(out, ref, atol=5e-2, rtol=5e-2), "f32 mismatch vs reference"

    # bf16 activations/weights (v6e/v7x fast path); accumulation stays f32.
    out_bf = layer3_forward(
        x.astype(jnp.bfloat16), weight.astype(jnp.bfloat16),
        bias.astype(jnp.bfloat16), skip.astype(jnp.bfloat16))
    jax.block_until_ready(out_bf)
    assert jnp.allclose(out_bf.astype(jnp.float32), ref, atol=0.25, rtol=0.1), \
        "bf16 mismatch vs reference"

    # Tiny ragged shape: batch padded to a sublane multiple, full-H tiles.
    bs, hs = 20, 32
    xs = jax.random.normal(k_x, (bs, hs), dtype=jnp.float32)
    ws = jax.random.normal(k_w, (hs, hs), dtype=jnp.float32) * 0.05
    bb = jax.random.normal(k_b, (hs,), dtype=jnp.float32) * 0.05
    ss = jax.random.normal(k_s, (bs, hs), dtype=jnp.float32)
    ref_s = jnp.dot(xs, ws.T, precision=lax.Precision.HIGHEST) + bb + ss
    out_s = layer3_forward(xs, ws, bb, ss)
    jax.block_until_ready(out_s)
    assert jnp.allclose(out_s, ref_s, atol=1e-2, rtol=1e-2), "small-shape mismatch"

    print("KERNEL_OK")
</pallas_src>

<mosaic_0001>
module attributes {stable_mosaic.version = 11 : i64} {
  func.func @_layer3_kernel(%arg0: i32, %arg1: i32, %arg2: i32, %arg3: memref<256x256xf32, #tpu.memory_space<vmem>>, %arg4: memref<256x256xf32, #tpu.memory_space<vmem>>, %arg5: memref<1x256xf32, #tpu.memory_space<vmem>>, %arg6: memref<256x256xf32, #tpu.memory_space<vmem>>, %arg7: memref<256x256xf32, #tpu.memory_space<vmem>>, %arg8: memref<256x256xf32, #tpu.memory_space<vmem>>) attributes {dimension_semantics = [#tpu.dimension_semantics<parallel>, #tpu.dimension_semantics<parallel>, #tpu.dimension_semantics<arbitrary>], iteration_bounds = array<i64: 2, 2, 2>, scalar_prefetch = 0 : i64, scratch_operands = 1 : i64, tpu.core_type = #tpu.core_type<tc>, window_params = [{transform_indices = @transform_0, window_bounds = array<i64: 256, 256>}, {transform_indices = @transform_1, window_bounds = array<i64: 256, 256>}, {transform_indices = @transform_2, window_bounds = array<i64: 1, 256>}, {transform_indices = @transform_3, window_bounds = array<i64: 256, 256>}, {transform_indices = @transform_4, window_bounds = array<i64: 256, 256>}]} {
    %c0_i32 = arith.constant 0 : i32
    %0 = arith.cmpi eq, %arg2, %c0_i32 : i32
    %1 = arith.extui %0 : i1 to i32
    %c0_i32_0 = arith.constant 0 : i32
    %2 = arith.cmpi ne, %1, %c0_i32_0 : i32
    scf.if %2 {
      %cst_9 = arith.constant 0.000000e+00 : f32
      %12 = vector.broadcast %cst_9 : f32 to vector<256x256xf32>
      %c0_10 = arith.constant 0 : index
      %c0_11 = arith.constant 0 : index
      %13 = vector.load %arg8[%c0_10, %c0_11] : memref<256x256xf32, #tpu.memory_space<vmem>>, vector<256x256xf32>
      tpu.vector_store %arg8[%c0_10, %c0_11], %12 {strides = array<i32>} : memref<256x256xf32, #tpu.memory_space<vmem>>, vector<256x256xf32>,
    } else {
    }
    %c0 = arith.constant 0 : index
    %c0_1 = arith.constant 0 : index
    %3 = vector.load %arg8[%c0, %c0_1] : memref<256x256xf32, #tpu.memory_space<vmem>>, vector<256x256xf32>
    %c0_2 = arith.constant 0 : index
    %c0_3 = arith.constant 0 : index
    %4 = vector.load %arg3[%c0_2, %c0_3] : memref<256x256xf32, #tpu.memory_space<vmem>>, vector<256x256xf32>
    %c0_4 = arith.constant 0 : index
    %c0_5 = arith.constant 0 : index
    %5 = vector.load %arg4[%c0_4, %c0_5] : memref<256x256xf32, #tpu.memory_space<vmem>>, vector<256x256xf32>
    %cst = arith.constant dense<0.000000e+00> : vector<256x256xf32>
    %6 = tpu.matmul %4, %5, %cst {dimension_numbers = #tpu.dot_dimension_numbers<[1], [1], [0], [0], [0, 0, 1, 0], [], []>} : vector<256x256xf32>, vector<256x256xf32>, vector<256x256xf32> -> vector<256x256xf32>
    %7 = arith.addf %3, %6 : vector<256x256xf32>
    %c0_6 = arith.constant 0 : index
    %c0_7 = arith.constant 0 : index
    %8 = vector.load %arg8[%c0_6, %c0_7] : memref<256x256xf32, #tpu.memory_space<vmem>>, vector<256x256xf32>
    tpu.vector_store %arg8[%c0_6, %c0_7], %7 {strides = array<i32>} : memref<256x256xf32, #tpu.memory_space<vmem>>, vector<256x256xf32>,
    %c1_i32 = arith.constant 1 : i32
    %9 = arith.cmpi eq, %arg2, %c1_i32 : i32
    %10 = arith.extui %9 : i1 to i32
    %c0_i32_8 = arith.constant 0 : i32
    %11 = arith.cmpi ne, %10, %c0_i32_8 : i32
    scf.if %11 {
      %c0_9 = arith.constant 0 : index
      %c0_10 = arith.constant 0 : index
      %12 = vector.load %arg8[%c0_9, %c0_10] : memref<256x256xf32, #tpu.memory_space<vmem>>, vector<256x256xf32>
      %c0_11 = arith.constant 0 : index
      %c0_12 = arith.constant 0 : index
      %13 = vector.load %arg5[%c0_11, %c0_12] : memref<1x256xf32, #tpu.memory_space<vmem>>, vector<1x256xf32>
      %14 = vector.broadcast %13 : vector<1x256xf32> to vector<256x256xf32>
      %15 = arith.addf %12, %14 : vector<256x256xf32>
      %c0_13 = arith.constant 0 : index
      %c0_14 = arith.constant 0 : index
      %16 = vector.load %arg6[%c0_13, %c0_14] : memref<256x256xf32, #tpu.memory_space<vmem>>, vector<256x256xf32>
      %17 = arith.addf %15, %16 : vector<256x256xf32>
      %c0_15 = arith.constant 0 : index
      %c0_16 = arith.constant 0 : index
      %18 = vector.load %arg7[%c0_15, %c0_16] : memref<256x256xf32, #tpu.memory_space<vmem>>, vector<256x256xf32>
      tpu.vector_store %arg7[%c0_15, %c0_16], %17 {strides = array<i32>} : memref<256x256xf32, #tpu.memory_space<vmem>>, vector<256x256xf32>,
    } else {
    }
    return
  }
  func.func @transform_0(%arg0: i32, %arg1: i32, %arg2: i32) -> (i32, i32) {
    %c0_i32 = arith.constant 0 : i32
    return %arg0, %arg2 : i32, i32
  }
  func.func @transform_1(%arg0: i32, %arg1: i32, %arg2: i32) -> (i32, i32) {
    %c0_i32 = arith.constant 0 : i32
    return %arg1, %arg2 : i32, i32
  }
  func.func @transform_2(%arg0: i32, %arg1: i32, %arg2: i32) -> (i32, i32) {
    %c0_i32 = arith.constant 0 : i32
    %c0_i32_0 = arith.constant 0 : i32
    return %c0_i32, %arg1 : i32, i32
  }
  func.func @transform_3(%arg0: i32, %arg1: i32, %arg2: i32) -> (i32, i32) {
    %c0_i32 = arith.constant 0 : i32
    return %arg0, %arg1 : i32, i32
  }
  func.func @transform_4(%arg0: i32, %arg1: i32, %arg2: i32) -> (i32, i32) {
    %c0_i32 = arith.constant 0 : i32
    return %arg0, %arg1 : i32, i32
  }
}

</mosaic_0001>

<bundles_post_ra>
// kernel: tpu_custom_call.1
= control target key start
LH: loop header
LB: loop body
LE: loop exit
PB: predicated region body
PF: predicated region fallthrough
CT: control target
= control target key end

     0   :  { %s3387_s0 = inlined_call_operand.vmem [shape: f32[512,512], index: 0, kind: input, shape index: {}]   ;;  %s3388_s1 = inlined_call_operand.vmem [shape: f32[512,512], index: 1, kind: input, shape index: {}]   ;;  %s3389_s2 = inlined_call_operand.hbm [shape: f32[1,512], index: 2, kind: input, shape index: {}]   ;;  %s3390_s3 = inlined_call_operand.hbm [shape: f32[512,512], index: 3, kind: input, shape index: {}, may-alias: {3,4}]   ;;  %s3391_s4 = inlined_call_operand.hbm [shape: f32[512,512], index: 4, kind: output, shape index: {}, may-alias: {3,4}]  }
   0x1   :  { %3404 = sst [smem:[#allocation27_spill]] %s3387_s0 }
   0x2   :  { %3405 = sst [smem:[#allocation28_spill]] %s3388_s1 }
   0x3   :  { %3406 = sst [smem:[#allocation29_spill]] %s3391_s4 }
   0x4   :  { %9 = vsyncpa [#allocation6], 0 }
   0x5   :  { %11 = vsyncpa [#allocation6 + $0x1], 0 }
   0x6   :  { %12 = vsyncpa [#allocation9], 0 }
   0x7   :  { %14 = vsyncpa [#allocation9 + $0x1], 0 }
   0x8   :  { %15 = vsyncpa [#allocation7], 0 }
   0x9   :  { %17 = vsyncpa [#allocation7 + $0x1], 0  ;;  %s2349_s15 = smov 0   ;;  %s2351_s16 = smov 0  }
   0xa   :  { %s2353_s17 = smov 0   ;;  %s2355_s18 = smov 0  }
   0xb   :  { %s2357_s19 = smov 0   ;;  %s2359_s20 = smov 0  }
   0xc   :  { %s2361_s21 = smov 0   ;;  %s2363_s22 = smov 0  }
   0xd   :  { %s2365_s23 = smov 0   ;;  %s2367_s24 = smov 0  }
   0xe   :  { %s2369_s25 = smov 0   ;;  %s2371_s26 = smov 0  }
   0xf   :  { %s2373_s27 = smov 0   ;;  %s2375_s28 = smov 0  }
  0x10   :  { %s2377_s29 = smov 0   ;;  %s2379_s30 = smov 0  }
  0x11   :  { %s2381_s5 = smov 0  }
  0x12 LB: > { %3407 = sst [smem:[#allocation14_spill]] %s2248_s15  ;;  %s35_s8 = sadd.s32 1, %s2300_s28  ;;  %s2312_s5 = sphi %s2381_s5, %s23_s5   ;;  %s2308_s30 = sphi %s2379_s30, %s3469_s30   ;;  %s2304_s29 = sphi %s2377_s29, %s3468_s29   ;;  %s2300_s28 = sphi %s2375_s28, %s3467_s28   ;;  %s2296_s27 = sphi %s2373_s27, %s3466_s27   ;;  %s2292_s26 = sphi %s2371_s26, %s3465_s26   ;;  %s2288_s25 = sphi %s2369_s25, %s3464_s25   ;;  %s2284_s24 = sphi %s2367_s24, %s3463_s24   ;;  %s2280_s23 = sphi %s2365_s23, %s3462_s23   ;;  %s2276_s22 = sphi %s2363_s22, %s3461_s22   ;;  %s2272_s21 = sphi %s2361_s21, %s3460_s21   ;;  %s2268_s20 = sphi %s2359_s20, %s3459_s20   ;;  %s2264_s19 = sphi %s2357_s19, %s3458_s19   ;;  %s2260_s18 = sphi %s2355_s18, %s3457_s18   ;;  %s2256_s17 = sphi %s2353_s17, %s3456_s17   ;;  %s2252_s16 = sphi %s2351_s16, %s3455_s16   ;;  %s2248_s15 = sphi %s2349_s15, %s3454_s15  }
  0x13   : > { %3408 = sst [smem:[#allocation15_spill]] %s2272_s21  ;;  %s38_s9 = sadd.s32 1, %s2304_s29 }
  0x14   : > { %3409 = sst [smem:[#allocation16_spill]] %s2288_s25  ;;  %p36_p0 = scmp.ge.s32.totalorder %s35_s8, 2 }
  0x15   : > { %3410 = sst [smem:[#allocation17_spill]] %s2292_s26  ;;  %s42_s10 = sadd.s32 1, %s2308_s30 }
  0x16   : > { %3411 = sst [smem:[#allocation18_spill]] %s2296_s27  ;;  %s51_s11 = sadd.s32 1, %s2284_s24 }
  0x17   : > { %p58_p1 = scmp.ne.s32.totalorder %s2284_s24, %s2280_s23  ;;  %s3471_s8 = smov (%p36_p0, %s35_s8), 0 }
  0x18   : > { %3412 = sst [smem:[#allocation19_spill]] %s3471_s8  ;;  %s3473_s9 = smov (!%p36_p0, %s38_s9), %s2304_s29 }
  0x19   : > { %s47_s12 = ssub.s32 %s2300_s28, %s3471_s8  ;;  %p59_p2 = scmp.eq.s32.totalorder %s2312_s5, 0 }
  0x1a   : > { %p40_p3 = scmp.ge.s32.totalorder %s3473_s9, 2  ;;  %s79_s13 = sadd.s32 1, %s2276_s22 }
  0x1b   : > { %p2451_p4 = por %p59_p2, %p58_p1  ;;  %p86_p5 = scmp.ne.s32.totalorder %s2276_s22, %s2272_s21 }
  0x1c   : > { %s3475_s9 = smov (%p40_p3, %s3473_s9), 0  ;;  %s3477_s10 = smov (!%p40_p3, %s42_s10), %s2308_s30 }
  0x1d   : > { %3414 = sst [smem:[#allocation20_spill]] %s3475_s9  ;;  %s74_s7 = ssub.s32 %s2304_s29, %s3475_s9 }
  0x1e   : > { %p2464_p6 = por %p86_p5, %p59_p2  ;;  %p44_p7 = scmp.ge.s32.totalorder %s3477_s10, 2 }
  0x1f   : > { %s76_s8 = sor.u32 %s74_s7, %s47_s12  ;;  %p103_p9 = scmp.eq.s32.totalorder %s74_s7, 0 }
  0x20   : > { %p77_p8 = scmp.eq.s32.totalorder %s76_s8, 0  ;;  %s3479_s10 = smov (%p44_p7, %s3477_s10), 0 }
  0x21   : > { %3416 = sst [smem:[#allocation21_spill]] %s3479_s10  ;;  %s46_s9 = ssub.s32 %s2308_s30, %s3479_s10 }
  0x22   : > { %s2471_s4 = scalar_select %p77_p8, %s2276_s22, %s79_s13  }
  0x23   : > { %s105_s27 = sadd.s32 1, %s2268_s20  ;;  %s48_s26 = sor.u32 %s47_s12, %s46_s9 }
  0x24   : > { %3417 = sst [smem:[#allocation22_spill]] %s2471_s4  ;;  %p112_p10 = scmp.ne.s32.totalorder %s2268_s20, %s2264_s19 }
  0x25   : > { %p49_p11 = scmp.eq.s32.totalorder %s48_s26, 0  ;;  %p118_p12 = scmp.ne.s32.totalorder %s2264_s19, %s2260_s18 }
  0x26   : > { %s2481_s8 = scalar_select %p103_p9, %s2268_s20, %s105_s27  }
  0x27   : > { %s2484_s25 = scalar_select %p49_p11, %s2284_s24, %s51_s11  }
  0x28   : > { %3418 = sst [smem:[#allocation23_spill]] %s2481_s8  ;;  %p2488_p13 = por %p112_p10, %p59_p2 }
  0x29   : > { %3419 = sst [smem:[#allocation24_spill]] %s2484_s25  ;;  %s3421_s4 = sadd.s32 4294967295, %s2312_s5  }
  0x2a   : > { %p119_p0 = scmp.eq.s32.totalorder %s3421_s4, 0  ;;  %s130_s10 = sor.u32 %s74_s7, %s46_s9 }
  0x2b   : > { %s133_s21 = sadd.s32 1, %s2256_s17  ;;  %p131_p3 = scmp.eq.s32.totalorder %s130_s10, 0 }
  0x2c   : > { %p2495_p1 = por %p119_p0, %p118_p12  ;;  %p140_p5 = scmp.ne.s32.totalorder %s2256_s17, %s2252_s16 }
  0x2d   : > { %p146_p7 = scmp.ne.s32.totalorder %s2252_s16, %s2248_s15  ;;  %p172_p10 = scmp.eq.s32.totalorder %s3421_s4, 7 }
  0x2e   : > { %s3422_s12 = scalar_select %p2495_p1, 1, 0 }
  0x2f   : > { %s2504_s18 = scalar_select %p131_p3, %s2256_s17, %s133_s21  }
  0x30   : > { %p2508_p8 = por %p140_p5, %p59_p2  ;;  %p2512_p9 = por %p146_p7, %p119_p0 }
  0x31   : > { %3423 = sst [smem:[#allocation25_spill]] %s2504_s18  ;;  %s3426_s7 = sadd.s32 4294967294, %s2312_s5  }
  0x32   : > { %s3424_s26 = scalar_select %p2508_p8, 1, 0 }
  0x33   : > { %s3425_s27 = scalar_select %p2512_p9, 1, 0 }
  0x34   : > { %p178_p11 = scmp.eq.s32.totalorder %s3426_s7, 7  ;;  %p2520_p12 = por %p172_p10, %p140_p5 }
  0x35   : > { %p1793_p2 = scmp.ge.s32.totalorder %s2312_s5, 8 }
  0x36   : > { %s3427_s9 = scalar_select %p2520_p12, 1, 0 }
  0x37   : > { %p2524_p1 = por %p178_p11, %p146_p7  ;;  %194 = sbr.rel (%p1793_p2) target bundleno = 201 (0xc9), region = 16 }
  0x38   : > { %3428 = sst [smem:[#allocation26_spill]] %s3427_s9 }
  0x39   : > { %s3429_s21 = scalar_select %p2524_p1, 1, 0 }
  0x3e   : > { %197 = sbr.rel (!%p2451_p4) target bundleno = 104 (0x68), region = 20  ;;  %s199_s10 = sand.u32 (%p2451_p4), 1, %s2284_s24  }
  0x3f   : > { %s1796_s11 = sshll.u32 (%p2451_p4), %s2300_s28, 1  ;;  %s1794_s4 = sshll.u32 (%p2451_p4), %s199_s10, 9 }
  0x40   : > { %s1827_s7 = sshll.u32 (%p2451_p4), %s2308_s30, 7  ;;  %s3430_s0 = sld [smem:[#allocation27_spill]] (%p2451_p4) }
  0x41   : > { %s205_s25 = sadd.s32 (%p2451_p4), %s1827_s7, %s1796_s11  ;;  %s2542_s14 = scalar_lea.vmem (%p2451_p4), [#allocation3], %s1794_s4 }
  0x42   : > { %s1798_s8 = sshll.u32 (%p2451_p4), %s205_s25, 3 }
  0x46   : > { %s2537_s9 = scalar_lea.vmem %s3430_s0, %s1798_s8 }
  0x47   : > { %v220_v0 = vld [vmem:[%s2537_s9] sm:$0xff]  ;;  %v222_v1 = vld [vmem:[%s2537_s9 + $0x8] sm:$0xff] }
  0x48   : > { %v224_v2 = vld [vmem:[%s2537_s9 + $0x20] sm:$0xff]  ;;  %221 = vst [vmem:[%s2542_s14] sm:$0xff] %v220_v0  ;;  %223 = vst [vmem:[%s2542_s14 + $0x8] sm:$0xff] %v222_v1  ;;  %v226_v3 = vld [vmem:[%s2537_s9 + $0x28] sm:$0xff] }
  0x49   : > { %225 = vst [vmem:[%s2542_s14 + $0x10] sm:$0xff] %v224_v2  ;;  %v228_v4 = vld [vmem:[%s2537_s9 + $0x40] sm:$0xff]  ;;  %v230_v5 = vld [vmem:[%s2537_s9 + $0x48] sm:$0xff]  ;;  %227 = vst [vmem:[%s2542_s14 + $0x18] sm:$0xff] %v226_v3 }
  0x4a   : > { %229 = vst [vmem:[%s2542_s14 + $0x20] sm:$0xff] %v228_v4  ;;  %231 = vst [vmem:[%s2542_s14 + $0x28] sm:$0xff] %v230_v5  ;;  %v232_v6 = vld [vmem:[%s2537_s9 + $0x60] sm:$0xff]  ;;  %v234_v7 = vld [vmem:[%s2537_s9 + $0x68] sm:$0xff] }
  0x4b   : > { %v236_v8 = vld [vmem:[%s2537_s9 + $0x80] sm:$0xff]  ;;  %233 = vst [vmem:[%s2542_s14 + $0x30] sm:$0xff] %v232_v6  ;;  %235 = vst [vmem:[%s2542_s14 + $0x38] sm:$0xff] %v234_v7  ;;  %v238_v9 = vld [vmem:[%s2537_s9 + $0x88] sm:$0xff] }
  0x4c   : > { %237 = vst [vmem:[%s2542_s14 + $0x40] sm:$0xff] %v236_v8  ;;  %v240_v10 = vld [vmem:[%s2537_s9 + $0xa0] sm:$0xff]  ;;  %v242_v11 = vld [vmem:[%s2537_s9 + $0xa8] sm:$0xff]  ;;  %239 = vst [vmem:[%s2542_s14 + $0x48] sm:$0xff] %v238_v9 }
  0x4d   : > { %241 = vst [vmem:[%s2542_s14 + $0x50] sm:$0xff] %v240_v10  ;;  %243 = vst [vmem:[%s2542_s14 + $0x58] sm:$0xff] %v242_v11  ;;  %v244_v12 = vld [vmem:[%s2537_s9 + $0xc0] sm:$0xff]  ;;  %v246_v13 = vld [vmem:[%s2537_s9 + $0xc8] sm:$0xff] }
  0x4e   : > { %v248_v14 = vld [vmem:[%s2537_s9 + $0xe0] sm:$0xff]  ;;  %245 = vst [vmem:[%s2542_s14 + $0x60] sm:$0xff] %v244_v12  ;;  %247 = vst [vmem:[%s2542_s14 + $0x68] sm:$0xff] %v246_v13  ;;  %v250_v15 = vld [vmem:[%s2537_s9 + $0xe8] sm:$0xff] }
  0x4f   : > { %249 = vst [vmem:[%s2542_s14 + $0x70] sm:$0xff] %v248_v14  ;;  %v252_v16 = vld [vmem:[%s2537_s9 + $0x100] sm:$0xff]  ;;  %v254_v17 = vld [vmem:[%s2537_s9 + $0x108] sm:$0xff]  ;;  %251 = vst [vmem:[%s2542_s14 + $0x78] sm:$0xff] %v250_v15 }
  0x50   : > { %253 = vst [vmem:[%s2542_s14 + $0x80] sm:$0xff] %v252_v16  ;;  %255 = vst [vmem:[%s2542_s14 + $0x88] sm:$0xff] %v254_v17  ;;  %v256_v18 = vld [vmem:[%s2537_s9 + $0x120] sm:$0xff]  ;;  %v258_v19 = vld [vmem:[%s2537_s9 + $0x128] sm:$0xff] }
  0x51   : > { %v260_v20 = vld [vmem:[%s2537_s9 + $0x140] sm:$0xff]  ;;  %257 = vst [vmem:[%s2542_s14 + $0x90] sm:$0xff] %v256_v18  ;;  %259 = vst [vmem:[%s2542_s14 + $0x98] sm:$0xff] %v258_v19  ;;  %v262_v21 = vld [vmem:[%s2537_s9 + $0x148] sm:$0xff] }
  0x52   : > { %261 = vst [vmem:[%s2542_s14 + $0xa0] sm:$0xff] %v260_v20  ;;  %v264_v22 = vld [vmem:[%s2537_s9 + $0x160] sm:$0xff]  ;;  %v266_v23 = vld [vmem:[%s2537_s9 + $0x168] sm:$0xff]  ;;  %263 = vst [vmem:[%s2542_s14 + $0xa8] sm:$0xff] %v262_v21 }
  0x53   : > { %265 = vst [vmem:[%s2542_s14 + $0xb0] sm:$0xff] %v264_v22  ;;  %267 = vst [vmem:[%s2542_s14 + $0xb8] sm:$0xff] %v266_v23  ;;  %v268_v24 = vld [vmem:[%s2537_s9 + $0x180] sm:$0xff]  ;;  %v270_v25 = vld [vmem:[%s2537_s9 + $0x188] sm:$0xff] }
  0x54   : > { %v272_v26 = vld [vmem:[%s2537_s9 + $0x1a0] sm:$0xff]  ;;  %269 = vst [vmem:[%s2542_s14 + $0xc0] sm:$0xff] %v268_v24  ;;  %271 = vst [vmem:[%s2542_s14 + $0xc8] sm:$0xff] %v270_v25  ;;  %v274_v27 = vld [vmem:[%s2537_s9 + $0x1a8] sm:$0xff] }
  0x55   : > { %273 = vst [vmem:[%s2542_s14 + $0xd0] sm:$0xff] %v272_v26  ;;  %v276_v28 = vld [vmem:[%s2537_s9 + $0x1c0] sm:$0xff]  ;;  %v278_v29 = vld [vmem:[%s2537_s9 + $0x1c8] sm:$0xff]  ;;  %275 = vst [vmem:[%s2542_s14 + $0xd8] sm:$0xff] %v274_v27 }
  0x56   : > { %277 = vst [vmem:[%s2542_s14 + $0xe0] sm:$0xff] %v276_v28  ;;  %279 = vst [vmem:[%s2542_s14 + $0xe8] sm:$0xff] %v278_v29  ;;  %v280_v30 = vld [vmem:[%s2537_s9 + $0x1e0] sm:$0xff]  ;;  %v282_v31 = vld [vmem:[%s2537_s9 + $0x1e8] sm:$0xff] }
  0x57   : > { %v284_v32 = vld [vmem:[%s2537_s9 + $0x200] sm:$0xff]  ;;  %281 = vst [vmem:[%s2542_s14 + $0xf0] sm:$0xff] %v280_v30  ;;  %283 = vst [vmem:[%s2542_s14 + $0xf8] sm:$0xff] %v282_v31  ;;  %v286_v33 = vld [vmem:[%s2537_s9 + $0x208] sm:$0xff] }
  0x58   : > { %285 = vst [vmem:[%s2542_s14 + $0x100] sm:$0xff] %v284_v32  ;;  %v288_v34 = vld [vmem:[%s2537_s9 + $0x220] sm:$0xff]  ;;  %v290_v35 = vld [vmem:[%s2537_s9 + $0x228] sm:$0xff]  ;;  %287 = vst [vmem:[%s2542_s14 + $0x108] sm:$0xff] %v286_v33 }
  0x59   : > { %289 = vst [vmem:[%s2542_s14 + $0x110] sm:$0xff] %v288_v34  ;;  %291 = vst [vmem:[%s2542_s14 + $0x118] sm:$0xff] %v290_v35  ;;  %v292_v36 = vld [vmem:[%s2537_s9 + $0x240] sm:$0xff]  ;;  %v294_v37 = vld [vmem:[%s2537_s9 + $0x248] sm:$0xff] }
  0x5a   : > { %v296_v38 = vld [vmem:[%s2537_s9 + $0x260] sm:$0xff]  ;;  %293 = vst [vmem:[%s2542_s14 + $0x120] sm:$0xff] %v292_v36  ;;  %295 = vst [vmem:[%s2542_s14 + $0x128] sm:$0xff] %v294_v37  ;;  %v298_v39 = vld [vmem:[%s2537_s9 + $0x268] sm:$0xff] }
  0x5b   : > { %297 = vst [vmem:[%s2542_s14 + $0x130] sm:$0xff] %v296_v38  ;;  %v300_v40 = vld [vmem:[%s2537_s9 + $0x280] sm:$0xff]  ;;  %v302_v41 = vld [vmem:[%s2537_s9 + $0x288] sm:$0xff]  ;;  %299 = vst [vmem:[%s2542_s14 + $0x138] sm:$0xff] %v298_v39 }
  0x5c   : > { %301 = vst [vmem:[%s2542_s14 + $0x140] sm:$0xff] %v300_v40  ;;  %303 = vst [vmem:[%s2542_s14 + $0x148] sm:$0xff] %v302_v41  ;;  %v304_v42 = vld [vmem:[%s2537_s9 + $0x2a0] sm:$0xff]  ;;  %v306_v43 = vld [vmem:[%s2537_s9 + $0x2a8] sm:$0xff] }
  0x5d   : > { %v308_v44 = vld [vmem:[%s2537_s9 + $0x2c0] sm:$0xff]  ;;  %305 = vst [vmem:[%s2542_s14 + $0x150] sm:$0xff] %v304_v42  ;;  %307 = vst [vmem:[%s2542_s14 + $0x158] sm:$0xff] %v306_v43  ;;  %v310_v45 = vld [vmem:[%s2537_s9 + $0x2c8] sm:$0xff] }
  0x5e   : > { %309 = vst [vmem:[%s2542_s14 + $0x160] sm:$0xff] %v308_v44  ;;  %v312_v46 = vld [vmem:[%s2537_s9 + $0x2e0] sm:$0xff]  ;;  %v314_v47 = vld [vmem:[%s2537_s9 + $0x2e8] sm:$0xff]  ;;  %311 = vst [vmem:[%s2542_s14 + $0x168] sm:$0xff] %v310_v45 }
  0x5f   : > { %313 = vst [vmem:[%s2542_s14 + $0x170] sm:$0xff] %v312_v46  ;;  %315 = vst [vmem:[%s2542_s14 + $0x178] sm:$0xff] %v314_v47  ;;  %v316_v48 = vld [vmem:[%s2537_s9 + $0x300] sm:$0xff]  ;;  %v318_v49 = vld [vmem:[%s2537_s9 + $0x308] sm:$0xff] }
  0x60   : > { %v320_v50 = vld [vmem:[%s2537_s9 + $0x320] sm:$0xff]  ;;  %317 = vst [vmem:[%s2542_s14 + $0x180] sm:$0xff] %v316_v48  ;;  %319 = vst [vmem:[%s2542_s14 + $0x188] sm:$0xff] %v318_v49  ;;  %v322_v51 = vld [vmem:[%s2537_s9 + $0x328] sm:$0xff] }
  0x61   : > { %321 = vst [vmem:[%s2542_s14 + $0x190] sm:$0xff] %v320_v50  ;;  %v324_v52 = vld [vmem:[%s2537_s9 + $0x340] sm:$0xff]  ;;  %v326_v53 = vld [vmem:[%s2537_s9 + $0x348] sm:$0xff]  ;;  %323 = vst [vmem:[%s2542_s14 + $0x198] sm:$0xff] %v322_v51 }
  0x62   : > { %325 = vst [vmem:[%s2542_s14 + $0x1a0] sm:$0xff] %v324_v52  ;;  %327 = vst [vmem:[%s2542_s14 + $0x1a8] sm:$0xff] %v326_v53  ;;  %v328_v54 = vld [vmem:[%s2537_s9 + $0x360] sm:$0xff]  ;;  %v330_v55 = vld [vmem:[%s2537_s9 + $0x368] sm:$0xff] }
  0x63   : > { %v332_v56 = vld [vmem:[%s2537_s9 + $0x380] sm:$0xff]  ;;  %329 = vst [vmem:[%s2542_s14 + $0x1b0] sm:$0xff] %v328_v54  ;;  %331 = vst [vmem:[%s2542_s14 + $0x1b8] sm:$0xff] %v330_v55  ;;  %v334_v57 = vld [vmem:[%s2537_s9 + $0x388] sm:$0xff] }
  0x64   : > { %333 = vst [vmem:[%s2542_s14 + $0x1c0] sm:$0xff] %v332_v56  ;;  %v336_v58 = vld [vmem:[%s2537_s9 + $0x3a0] sm:$0xff]  ;;  %v338_v59 = vld [vmem:[%s2537_s9 + $0x3a8] sm:$0xff]  ;;  %335 = vst [vmem:[%s2542_s14 + $0x1c8] sm:$0xff] %v334_v57 }
  0x65   : > { %337 = vst [vmem:[%s2542_s14 + $0x1d0] sm:$0xff] %v336_v58  ;;  %339 = vst [vmem:[%s2542_s14 + $0x1d8] sm:$0xff] %v338_v59  ;;  %v340_v60 = vld [vmem:[%s2537_s9 + $0x3c0] sm:$0xff]  ;;  %v342_v61 = vld [vmem:[%s2537_s9 + $0x3c8] sm:$0xff] }
  0x66   : > { %v344_v62 = vld [vmem:[%s2537_s9 + $0x3e0] sm:$0xff]  ;;  %341 = vst [vmem:[%s2542_s14 + $0x1e0] sm:$0xff] %v340_v60  ;;  %343 = vst [vmem:[%s2542_s14 + $0x1e8] sm:$0xff] %v342_v61  ;;  %v346_v63 = vld [vmem:[%s2537_s9 + $0x3e8] sm:$0xff] }
  0x67   : > { %345 = vst [vmem:[%s2542_s14 + $0x1f0] sm:$0xff] %v344_v62  ;;  %347 = vst [vmem:[%s2542_s14 + $0x1f8] sm:$0xff] %v346_v63 }
  0x68 PF: > { %353 = sbr.rel (!%p2464_p6) target bundleno = 146 (0x92), region = 43  ;;  %s355_s15 = sand.u32 (%p2464_p6), 1, %s2276_s22  }
  0x69   : > { %s1801_s25 = sshll.u32 (%p2464_p6), %s2300_s28, 1  ;;  %s1799_s8 = sshll.u32 (%p2464_p6), %s355_s15, 9 }
  0x6a   : > { %s1828_s18 = sshll.u32 (%p2464_p6), %s2304_s29, 7  ;;  %s3431_s1 = sld [smem:[#allocation28_spill]] (%p2464_p6) }
  0x6b   : > { %s361_s10 = sadd.s32 (%p2464_p6), %s1828_s18, %s1801_s25  ;;  %s2682_s6 = scalar_lea.vmem (%p2464_p6), [#allocation4], %s1799_s8 }
  0x6c   : > { %s1803_s11 = sshll.u32 (%p2464_p6), %s361_s10, 3 }
  0x70   : > { %s2677_s0 = scalar_lea.vmem %s3431_s1, %s1803_s11 }
  0x71   : > { %v376_v0 = vld [vmem:[%s2677_s0] sm:$0xff]  ;;  %v378_v1 = vld [vmem:[%s2677_s0 + $0x8] sm:$0xff] }
  0x72   : > { %v380_v2 = vld [vmem:[%s2677_s0 + $0x20] sm:$0xff]  ;;  %377 = vst [vmem:[%s2682_s6] sm:$0xff] %v376_v0  ;;  %379 = vst [vmem:[%s2682_s6 + $0x8] sm:$0xff] %v378_v1  ;;  %v382_v3 = vld [vmem:[%s2677_s0 + $0x28] sm:$0xff] }
  0x73   : > { %381 = vst [vmem:[%s2682_s6 + $0x10] sm:$0xff] %v380_v2  ;;  %v384_v4 = vld [vmem:[%s2677_s0 + $0x40] sm:$0xff]  ;;  %v386_v5 = vld [vmem:[%s2677_s0 + $0x48] sm:$0xff]  ;;  %383 = vst [vmem:[%s2682_s6 + $0x18] sm:$0xff] %v382_v3 }
  0x74   : > { %385 = vst [vmem:[%s2682_s6 + $0x20] sm:$0xff] %v384_v4  ;;  %387 = vst [vmem:[%s2682_s6 + $0x28] sm:$0xff] %v386_v5  ;;  %v388_v6 = vld [vmem:[%s2677_s0 + $0x60] sm:$0xff]  ;;  %v390_v7 = vld [vmem:[%s2677_s0 + $0x68] sm:$0xff] }
  0x75   : > { %v392_v8 = vld [vmem:[%s2677_s0 + $0x80] sm:$0xff]  ;;  %389 = vst [vmem:[%s2682_s6 + $0x30] sm:$0xff] %v388_v6  ;;  %391 = vst [vmem:[%s2682_s6 + $0x38] sm:$0xff] %v390_v7  ;;  %v394_v9 = vld [vmem:[%s2677_s0 + $0x88] sm:$0xff] }
  0x76   : > { %393 = vst [vmem:[%s2682_s6 + $0x40] sm:$0xff] %v392_v8  ;;  %v396_v10 = vld [vmem:[%s2677_s0 + $0xa0] sm:$0xff]  ;;  %v398_v11 = vld [vmem:[%s2677_s0 + $0xa8] sm:$0xff]  ;;  %395 = vst [vmem:[%s2682_s6 + $0x48] sm:$0xff] %v394_v9 }
  0x77   : > { %397 = vst [vmem:[%s2682_s6 + $0x50] sm:$0xff] %v396_v10  ;;  %399 = vst [vmem:[%s2682_s6 + $0x58] sm:$0xff] %v398_v11  ;;  %v400_v12 = vld [vmem:[%s2677_s0 + $0xc0] sm:$0xff]  ;;  %v402_v13 = vld [vmem:[%s2677_s0 + $0xc8] sm:$0xff] }
  0x78   : > { %v404_v14 = vld [vmem:[%s2677_s0 + $0xe0] sm:$0xff]  ;;  %401 = vst [vmem:[%s2682_s6 + $0x60] sm:$0xff] %v400_v12  ;;  %403 = vst [vmem:[%s2682_s6 + $0x68] sm:$0xff] %v402_v13  ;;  %v406_v15 = vld [vmem:[%s2677_s0 + $0xe8] sm:$0xff] }
  0x79   : > { %405 = vst [vmem:[%s2682_s6 + $0x70] sm:$0xff] %v404_v14  ;;  %v408_v16 = vld [vmem:[%s2677_s0 + $0x100] sm:$0xff]  ;;  %v410_v17 = vld [vmem:[%s2677_s0 + $0x108] sm:$0xff]  ;;  %407 = vst [vmem:[%s2682_s6 + $0x78] sm:$0xff] %v406_v15 }
  0x7a   : > { %409 = vst [vmem:[%s2682_s6 + $0x80] sm:$0xff] %v408_v16  ;;  %411 = vst [vmem:[%s2682_s6 + $0x88] sm:$0xff] %v410_v17  ;;  %v412_v18 = vld [vmem:[%s2677_s0 + $0x120] sm:$0xff]  ;;  %v414_v19 = vld [vmem:[%s2677_s0 + $0x128] sm:$0xff] }
  0x7b   : > { %v416_v20 = vld [vmem:[%s2677_s0 + $0x140] sm:$0xff]  ;;  %413 = vst [vmem:[%s2682_s6 + $0x90] sm:$0xff] %v412_v18  ;;  %415 = vst [vmem:[%s2682_s6 + $0x98] sm:$0xff] %v414_v19  ;;  %v418_v21 = vld [vmem:[%s2677_s0 + $0x148] sm:$0xff] }
  0x7c   : > { %417 = vst [vmem:[%s2682_s6 + $0xa0] sm:$0xff] %v416_v20  ;;  %v420_v22 = vld [vmem:[%s2677_s0 + $0x160] sm:$0xff]  ;;  %v422_v23 = vld [vmem:[%s2677_s0 + $0x168] sm:$0xff]  ;;  %419 = vst [vmem:[%s2682_s6 + $0xa8] sm:$0xff] %v418_v21 }
  0x7d   : > { %421 = vst [vmem:[%s2682_s6 + $0xb0] sm:$0xff] %v420_v22  ;;  %423 = vst [vmem:[%s2682_s6 + $0xb8] sm:$0xff] %v422_v23  ;;  %v424_v24 = vld [vmem:[%s2677_s0 + $0x180] sm:$0xff]  ;;  %v426_v25 = vld [vmem:[%s2677_s0 + $0x188] sm:$0xff] }
  0x7e   : > { %v428_v26 = vld [vmem:[%s2677_s0 + $0x1a0] sm:$0xff]  ;;  %425 = vst [vmem:[%s2682_s6 + $0xc0] sm:$0xff] %v424_v24  ;;  %427 = vst [vmem:[%s2682_s6 + $0xc8] sm:$0xff] %v426_v25  ;;  %v430_v27 = vld [vmem:[%s2677_s0 + $0x1a8] sm:$0xff] }
  0x7f   : > { %429 = vst [vmem:[%s2682_s6 + $0xd0] sm:$0xff] %v428_v26  ;;  %v432_v28 = vld [vmem:[%s2677_s0 + $0x1c0] sm:$0xff]  ;;  %v434_v29 = vld [vmem:[%s2677_s0 + $0x1c8] sm:$0xff]  ;;  %431 = vst [vmem:[%s2682_s6 + $0xd8] sm:$0xff] %v430_v27 }
  0x80   : > { %433 = vst [vmem:[%s2682_s6 + $0xe0] sm:$0xff] %v432_v28  ;;  %435 = vst [vmem:[%s2682_s6 + $0xe8] sm:$0xff] %v434_v29  ;;  %v436_v30 = vld [vmem:[%s2677_s0 + $0x1e0] sm:$0xff]  ;;  %v438_v31 = vld [vmem:[%s2677_s0 + $0x1e8] sm:$0xff] }
  0x81   : > { %v440_v32 = vld [vmem:[%s2677_s0 + $0x200] sm:$0xff]  ;;  %437 = vst [vmem:[%s2682_s6 + $0xf0] sm:$0xff] %v436_v30  ;;  %439 = vst [vmem:[%s2682_s6 + $0xf8] sm:$0xff] %v438_v31  ;;  %v442_v33 = vld [vmem:[%s2677_s0 + $0x208] sm:$0xff] }
  0x82   : > { %441 = vst [vmem:[%s2682_s6 + $0x100] sm:$0xff] %v440_v32  ;;  %v444_v34 = vld [vmem:[%s2677_s0 + $0x220] sm:$0xff]  ;;  %v446_v35 = vld [vmem:[%s2677_s0 + $0x228] sm:$0xff]  ;;  %443 = vst [vmem:[%s2682_s6 + $0x108] sm:$0xff] %v442_v33 }
  0x83   : > { %445 = vst [vmem:[%s2682_s6 + $0x110] sm:$0xff] %v444_v34  ;;  %447 = vst [vmem:[%s2682_s6 + $0x118] sm:$0xff] %v446_v35  ;;  %v448_v36 = vld [vmem:[%s2677_s0 + $0x240] sm:$0xff]  ;;  %v450_v37 = vld [vmem:[%s2677_s0 + $0x248] sm:$0xff] }
  0x84   : > { %v452_v38 = vld [vmem:[%s2677_s0 + $0x260] sm:$0xff]  ;;  %449 = vst [vmem:[%s2682_s6 + $0x120] sm:$0xff] %v448_v36  ;;  %451 = vst [vmem:[%s2682_s6 + $0x128] sm:$0xff] %v450_v37  ;;  %v454_v39 = vld [vmem:[%s2677_s0 + $0x268] sm:$0xff] }
  0x85   : > { %453 = vst [vmem:[%s2682_s6 + $0x130] sm:$0xff] %v452_v38  ;;  %v456_v40 = vld [vmem:[%s2677_s0 + $0x280] sm:$0xff]  ;;  %v458_v41 = vld [vmem:[%s2677_s0 + $0x288] sm:$0xff]  ;;  %455 = vst [vmem:[%s2682_s6 + $0x138] sm:$0xff] %v454_v39 }
  0x86   : > { %457 = vst [vmem:[%s2682_s6 + $0x140] sm:$0xff] %v456_v40  ;;  %459 = vst [vmem:[%s2682_s6 + $0x148] sm:$0xff] %v458_v41  ;;  %v460_v42 = vld [vmem:[%s2677_s0 + $0x2a0] sm:$0xff]  ;;  %v462_v43 = vld [vmem:[%s2677_s0 + $0x2a8] sm:$0xff] }
  0x87   : > { %v464_v44 = vld [vmem:[%s2677_s0 + $0x2c0] sm:$0xff]  ;;  %461 = vst [vmem:[%s2682_s6 + $0x150] sm:$0xff] %v460_v42  ;;  %463 = vst [vmem:[%s2682_s6 + $0x158] sm:$0xff] %v462_v43  ;;  %v466_v45 = vld [vmem:[%s2677_s0 + $0x2c8] sm:$0xff] }
  0x88   : > { %465 = vst [vmem:[%s2682_s6 + $0x160] sm:$0xff] %v464_v44  ;;  %v468_v46 = vld [vmem:[%s2677_s0 + $0x2e0] sm:$0xff]  ;;  %v470_v47 = vld [vmem:[%s2677_s0 + $0x2e8] sm:$0xff]  ;;  %467 = vst [vmem:[%s2682_s6 + $0x168] sm:$0xff] %v466_v45 }
  0x89   : > { %469 = vst [vmem:[%s2682_s6 + $0x170] sm:$0xff] %v468_v46  ;;  %471 = vst [vmem:[%s2682_s6 + $0x178] sm:$0xff] %v470_v47  ;;  %v472_v48 = vld [vmem:[%s2677_s0 + $0x300] sm:$0xff]  ;;  %v474_v49 = vld [vmem:[%s2677_s0 + $0x308] sm:$0xff] }
  0x8a   : > { %v476_v50 = vld [vmem:[%s2677_s0 + $0x320] sm:$0xff]  ;;  %473 = vst [vmem:[%s2682_s6 + $0x180] sm:$0xff] %v472_v48  ;;  %475 = vst [vmem:[%s2682_s6 + $0x188] sm:$0xff] %v474_v49  ;;  %v478_v51 = vld [vmem:[%s2677_s0 + $0x328] sm:$0xff] }
  0x8b   : > { %477 = vst [vmem:[%s2682_s6 + $0x190] sm:$0xff] %v476_v50  ;;  %v480_v52 = vld [vmem:[%s2677_s0 + $0x340] sm:$0xff]  ;;  %v482_v53 = vld [vmem:[%s2677_s0 + $0x348] sm:$0xff]  ;;  %479 = vst [vmem:[%s2682_s6 + $0x198] sm:$0xff] %v478_v51 }
  0x8c   : > { %481 = vst [vmem:[%s2682_s6 + $0x1a0] sm:$0xff] %v480_v52  ;;  %483 = vst [vmem:[%s2682_s6 + $0x1a8] sm:$0xff] %v482_v53  ;;  %v484_v54 = vld [vmem:[%s2677_s0 + $0x360] sm:$0xff]  ;;  %v486_v55 = vld [vmem:[%s2677_s0 + $0x368] sm:$0xff] }
  0x8d   : > { %v488_v56 = vld [vmem:[%s2677_s0 + $0x380] sm:$0xff]  ;;  %485 = vst [vmem:[%s2682_s6 + $0x1b0] sm:$0xff] %v484_v54  ;;  %487 = vst [vmem:[%s2682_s6 + $0x1b8] sm:$0xff] %v486_v55  ;;  %v490_v57 = vld [vmem:[%s2677_s0 + $0x388] sm:$0xff] }
  0x8e   : > { %489 = vst [vmem:[%s2682_s6 + $0x1c0] sm:$0xff] %v488_v56  ;;  %v492_v58 = vld [vmem:[%s2677_s0 + $0x3a0] sm:$0xff]  ;;  %v494_v59 = vld [vmem:[%s2677_s0 + $0x3a8] sm:$0xff]  ;;  %491 = vst [vmem:[%s2682_s6 + $0x1c8] sm:$0xff] %v490_v57 }
  0x8f   : > { %493 = vst [vmem:[%s2682_s6 + $0x1d0] sm:$0xff] %v492_v58  ;;  %495 = vst [vmem:[%s2682_s6 + $0x1d8] sm:$0xff] %v494_v59  ;;  %v496_v60 = vld [vmem:[%s2677_s0 + $0x3c0] sm:$0xff]  ;;  %v498_v61 = vld [vmem:[%s2677_s0 + $0x3c8] sm:$0xff] }
  0x90   : > { %v500_v62 = vld [vmem:[%s2677_s0 + $0x3e0] sm:$0xff]  ;;  %497 = vst [vmem:[%s2682_s6 + $0x1e0] sm:$0xff] %v496_v60  ;;  %499 = vst [vmem:[%s2682_s6 + $0x1e8] sm:$0xff] %v498_v61  ;;  %v502_v63 = vld [vmem:[%s2677_s0 + $0x3e8] sm:$0xff] }
  0x91   : > { %501 = vst [vmem:[%s2682_s6 + $0x1f0] sm:$0xff] %v500_v62  ;;  %503 = vst [vmem:[%s2682_s6 + $0x1f8] sm:$0xff] %v502_v63 }
  0x92 PF: > { %s510_s9 = sand.u32 1, %s2268_s20   ;;  %s1829_s14 = sshll.u32 %s2304_s29, 5 }
  0x93   : > { %s1804_s15 = sshll.u32 %s510_s9, 1  ;;  %s2814_s18 = scalar_lea.hbm %s3389_s2, %s1829_s14 }
  0x94   : > { %s514_s10 = scalar_lea.vmem [#allocation5], %s1804_s15  ;;  %s529_s11 = sand.u32 1, %s2256_s17  }
  0x95   : > { %s522_s0 = sshll.u32 %s514_s10, 4  ;;  %s511_s4 = scalar_lea.sflag [#allocation6], %s510_s9  ;;  %s523_s0 = int_to_ptr.vmem [resolvable:$true] %s522_s0 }
  0x96   : > { %s2082_s7 = scalar_lea.hbm %s2814_s18, 32  ;;  %s2086_s25 = scalar_lea.hbm %s3389_s2, 64 }
  0x97   : > { %p2083_p4 = scmp.ne.s32.totalorder %s2814_s18, %s2082_s7  ;;  %p2087_p3 = scmp.lt.u32.totalorder %s2814_s18, %s3389_s2 }
  0x98   : > { %p2088_p5 = scmp.lt.u32.totalorder %s2086_s25, %s2082_s7  ;;  %p2090_p10 = scmp.lt.u32.totalorder %s2082_s7, %s2814_s18 }
  0x99   : > { %p2084_p6 = pnand %p2083_p4, %p2488_p13 }
  0x9a   : > { %p2089_p7 = por %p2088_p5, %p2087_p3 }
  0x9b   : > { %p2085_p0 = pneg %p2084_p6 }
  0x9c   : > { %p2091_p11 = por %p2090_p10, %p2089_p7 }
  0x9e   : > { %p2092_p2 = pnand %p2091_p11, %p2085_p0 }
  0xa0   : > { %2095 = shalt.err (!%p2092_p2)
}
  0xa1   : > { %s2096_s9 = scalar_lea.vmem %s523_s0, 32  ;;  %s2314_s15 = smov [#allocation5]  }
  0xa2   : > { %p2097_p1 = scmp.ne.s32.totalorder %s523_s0, %s2096_s9  ;;  %s2100_s10 = sshll.u32 %s2314_s15, 4  ;;  %s2101_s10 = int_to_ptr.vmem [resolvable:$false] %s2100_s10 }
  0xa3   : > { %s2102_s1 = scalar_lea.vmem %s2101_s10, 64  ;;  %p2103_p12 = scmp.lt.s32.totalorder %s523_s0, %s2101_s10 }
  0xa4   : > { %p2098_p4 = pnand %p2097_p1, %p2488_p13  ;;  %p2104_p9 = scmp.lt.s32.totalorder %s2102_s1, %s2096_s9 }
  0xa6   : > { %p2099_p6 = pneg %p2098_p4  ;;  %p2105_p8 = por %p2104_p9, %p2103_p12 }
  0xa8   : > { %p2106_p3 = pnand %p2105_p8, %p2099_p6 }
  0xaa   : > { %2109 = shalt.err (!%p2106_p3)
}
  0xab   : > { %1928 = dma.hbm_to_vmem [thread:$0]  (%p2488_p13), %s2814_s18, 32, %s523_s0, %s511_s4  }
  0xac   : > { %s1807_s7 = sshll.u32 %s529_s11, 9  ;;  %s1809_s6 = sshll.u32 %s2304_s29, 1 }
  0xad   : > { %s1830_s25 = sshll.u32 %s2308_s30, 7  ;;  %s533_s8 = scalar_lea.vmem [#allocation8], %s1807_s7 }
  0xae   : > { %s540_s14 = sadd.s32 %s1830_s25, %s1809_s6  ;;  %s543_s15 = sshll.u32 %s533_s8, 4  ;;  %s2838_s15 = int_to_ptr.vmem [resolvable:$true] %s543_s15 }
  0xaf   : > { %s1811_s9 = sshll.u32 %s540_s14, 7  ;;  %s2847_s18 = scalar_lea.sflag [#allocation9], %s529_s11 }
  0xb0   : > { %s2843_s13 = scalar_lea.hbm %s3390_s3, %s1811_s9  ;;  %p3432_p1 = scmp.ne.s32.totalorder %s3424_s26, 0 }
  0xb1   : > { %s2110_s0 = scalar_lea.hbm %s2843_s13, 8192  ;;  %s2114_s6 = scalar_lea.hbm %s3390_s3, 32768 }
  0xb2   : > { %p2111_p13 = scmp.ne.s32.totalorder %s2843_s13, %s2110_s0  ;;  %p2115_p12 = scmp.lt.u32.totalorder %s2843_s13, %s3390_s3 }
  0xb3   : > { %p2116_p0 = scmp.lt.u32.totalorder %s2114_s6, %s2110_s0  ;;  %p2118_p7 = scmp.lt.u32.totalorder %s2110_s0, %s2843_s13 }
  0xb4   : > { %p2112_p8 = pnand %p2111_p13, %p3432_p1 }
  0xb5   : > { %p2117_p5 = por %p2116_p0, %p2115_p12 }
  0xb6   : > { %p2113_p9 = pneg %p2112_p8 }
  0xb7   : > { %p2119_p10 = por %p2118_p7, %p2117_p5 }
  0xb9   : > { %p2120_p11 = pnand %p2119_p10, %p2113_p9 }
  0xbb   : > { %2123 = shalt.err (!%p2120_p11)
}
  0xbc   : > { %s2124_s11 = scalar_lea.vmem %s2838_s15, 8192  ;;  %s2315_s8 = smov [#allocation8]  }
  0xbd   : > { %p2125_p2 = scmp.ne.s32.totalorder %s2838_s15, %s2124_s11  ;;  %s2128_s9 = sshll.u32 %s2315_s8, 4  ;;  %s2129_s9 = int_to_ptr.vmem [resolvable:$false] %s2128_s9 }
  0xbe   : > { %s2130_s10 = scalar_lea.vmem %s2129_s9, 16384  ;;  %p2131_p3 = scmp.lt.s32.totalorder %s2838_s15, %s2129_s9 }
  0xbf   : > { %p2126_p4 = pnand %p2125_p2, %p3432_p1  ;;  %p2132_p13 = scmp.lt.s32.totalorder %s2130_s10, %s2124_s11 }
  0xc1   : > { %p2127_p6 = pneg %p2126_p4  ;;  %p2133_p8 = por %p2132_p13, %p2131_p3 }
  0xc3   : > { %p2134_p12 = pnand %p2133_p8, %p2127_p6 }
  0xc5   : > { %2137 = shalt.err (!%p2134_p12)
}
  0xc6   : > { %s2316_s1 = smov 512   ;;  %s2317_s0 = smov 256  }
  0xc7   : > { %s2318_s4 = smov 16  }
  0xc8   : > { %1929 = dma.hbm_to_vmem [thread:$0]  (%p3432_p1), %s2843_s13, 8192, %s2838_s15, %s2847_s18, %s2316_s1, %s2317_s0, %s2318_s4  }
  0xc9 PF: > { %p1812_p9 = scmp.ge.s32.totalorder %s2312_s5, 1  ;;  %p551_p0 = scmp.lt.s32.totalorder %s2312_s5, 9 }
  0xcb   : > { %p552_p5 = pnand %p1812_p9, %p551_p0 }
  0xcc   : > { %s3433_s7 = sld [smem:[#allocation15_spill]] (!%p552_p5)  ;;  %s558_s6 = sand.u32 (!%p552_p5), 1, %s2280_s23  }
  0xcd   : > { %555 = sbr.rel (%p552_p5) target bundleno = 736 (0x2e0), region = 74  ;;  %s1813_s14 = sshll.u32 (!%p552_p5), %s558_s6, 9 }
  0xce   : > { %s571_s8 = sand.u32 (!%p552_p5), 1, %s2264_s19   ;;  %s2878_s26 = scalar_lea.vmem (!%p552_p5), [#allocation3], %s1813_s14 }
  0xcf   : > { %s2876_s9 = sshll.u32 (!%p552_p5), %s571_s8, 1  ;;  %s572_s13 = scalar_lea.sflag (!%p552_p5), [#allocation6], %s571_s8 }
  0xd0   : > { %s575_s18 = scalar_lea.vmem (!%p552_p5), [#allocation5], %s2876_s9  ;;  %p3434_p1 = scmp.ne.s32.totalorder (!%p552_p5), %s3422_s12, 0 }
  0xd2   : > { %s565_s25 = sand.u32 (!%p552_p5), 1, %s3433_s7  }
  0xd3   : > { %s1814_s11 = sshll.u32 (!%p552_p5), %s565_s25, 9 }
  0xd4   : > { %s2880_s15 = scalar_lea.vmem [#allocation4], %s1814_s11 }
  0xd5   : > { %2235 = dma.done.wait (%p3434_p1), %s572_s13, 32  }
  0xd6   : > { %2237 = vsyncadd (%p3434_p1), %s572_s13, 4294967264  ;;  %s2888_s23 = sand.u32 1, %s2252_s16   ;;  %p3435_p7 = scmp.ne.s32.totalorder %s3425_s27, 0 }
  0xd7   : > { %s1816_s10 = sshll.u32 %s2888_s23, 9  ;;  %s581_s1 = scalar_lea.sflag [#allocation9], %s2888_s23 }
  0xd8   : > { %s2892_s0 = scalar_lea.vmem [#allocation8], %s1816_s10 }
  0xd9   : > { %2239 = dma.done.wait (%p3435_p7), %s581_s1, 8192  }
  0xda   : > { %2241 = vsyncadd (%p3435_p7), %s581_s1, 4294959104  ;;  %s2898_s4 = scalar_lea.vmem [#allocation10], %s1816_s10  ;;  %s3436_s7 = sld [smem:[#allocation16_spill]] }
  0xe0   : > { %p1818_p10 = scmp.ne.s32.totalorder %s3436_s7, 0 }
  0xe1   : > { %v2319_v0 = vmov (!%p1818_p10), 0.0  }
  0xe2   : > { %634 = sbr.rel (%p1818_p10) target bundleno = 258 (0x102), region = 94  ;;  %635 = vst [vmem:[#allocation2] sm:$0xff] (!%p1818_p10), %v2319_v0  ;;  %636 = vst [vmem:[#allocation2 + $0x8] sm:$0xff] (!%p1818_p10), %v2319_v0 }
  0xe3   : > { %637 = vst [vmem:[#allocation2 + $0x10] sm:$0xff] (!%p1818_p10), %v2319_v0  ;;  %638 = vst [vmem:[#allocation2 + $0x18] sm:$0xff] (!%p1818_p10), %v2319_v0 }
  0xe4   : > { %639 = vst [vmem:[#allocation2 + $0x20] sm:$0xff] (!%p1818_p10), %v2319_v0  ;;  %640 = vst [vmem:[#allocation2 + $0x28] sm:$0xff] (!%p1818_p10), %v2319_v0 }
  0xe5   : > { %641 = vst [vmem:[#allocation2 + $0x30] sm:$0xff] (!%p1818_p10), %v2319_v0  ;;  %642 = vst [vmem:[#allocation2 + $0x38] sm:$0xff] (!%p1818_p10), %v2319_v0 }
  0xe6   : > { %643 = vst [vmem:[#allocation2 + $0x40] sm:$0xff] (!%p1818_p10), %v2319_v0  ;;  %644 = vst [vmem:[#allocation2 + $0x48] sm:$0xff] (!%p1818_p10), %v2319_v0 }
  0xe7   : > { %645 = vst [vmem:[#allocation2 + $0x50] sm:$0xff] (!%p1818_p10), %v2319_v0  ;;  %646 = vst [vmem:[#allocation2 + $0x58] sm:$0xff] (!%p1818_p10), %v2319_v0 }
  0xe8   : > { %647 = vst [vmem:[#allocation2 + $0x60] sm:$0xff] (!%p1818_p10), %v2319_v0  ;;  %648 = vst [vmem:[#allocation2 + $0x68] sm:$0xff] (!%p1818_p10), %v2319_v0 }
  0xe9   : > { %649 = vst [vmem:[#allocation2 + $0x70] sm:$0xff] %v2319_v0  ;;  %650 = vst [vmem:[#allocation2 + $0x78] sm:$0xff] %v2319_v0 }
  0xea   : > { %651 = vst [vmem:[#allocation2 + $0x80] sm:$0xff] %v2319_v0  ;;  %652 = vst [vmem:[#allocation2 + $0x88] sm:$0xff] %v2319_v0 }
  0xeb   : > { %653 = vst [vmem:[#allocation2 + $0x90] sm:$0xff] %v2319_v0  ;;  %654 = vst [vmem:[#allocation2 + $0x98] sm:$0xff] %v2319_v0 }
  0xec   : > { %655 = vst [vmem:[#allocation2 + $0xa0] sm:$0xff] %v2319_v0  ;;  %656 = vst [vmem:[#allocation2 + $0xa8] sm:$0xff] %v2319_v0 }
  0xed   : > { %657 = vst [vmem:[#allocation2 + $0xb0] sm:$0xff] %v2319_v0  ;;  %658 = vst [vmem:[#allocation2 + $0xb8] sm:$0xff] %v2319_v0 }
  0xee   : > { %659 = vst [vmem:[#allocation2 + $0xc0] sm:$0xff] %v2319_v0  ;;  %660 = vst [vmem:[#allocation2 + $0xc8] sm:$0xff] %v2319_v0 }
  0xef   : > { %661 = vst [vmem:[#allocation2 + $0xd0] sm:$0xff] %v2319_v0  ;;  %662 = vst [vmem:[#allocation2 + $0xd8] sm:$0xff] %v2319_v0 }
  0xf0   : > { %663 = vst [vmem:[#allocation2 + $0xe0] sm:$0xff] %v2319_v0  ;;  %664 = vst [vmem:[#allocation2 + $0xe8] sm:$0xff] %v2319_v0 }
  0xf1   : > { %665 = vst [vmem:[#allocation2 + $0xf0] sm:$0xff] %v2319_v0  ;;  %666 = vst [vmem:[#allocation2 + $0xf8] sm:$0xff] %v2319_v0 }
  0xf2   : > { %667 = vst [vmem:[#allocation2 + $0x100] sm:$0xff] %v2319_v0  ;;  %668 = vst [vmem:[#allocation2 + $0x108] sm:$0xff] %v2319_v0 }
  0xf3   : > { %669 = vst [vmem:[#allocation2 + $0x110] sm:$0xff] %v2319_v0  ;;  %670 = vst [vmem:[#allocation2 + $0x118] sm:$0xff] %v2319_v0 }
  0xf4   : > { %671 = vst [vmem:[#allocation2 + $0x120] sm:$0xff] %v2319_v0  ;;  %672 = vst [vmem:[#allocation2 + $0x128] sm:$0xff] %v2319_v0 }
  0xf5   : > { %673 = vst [vmem:[#allocation2 + $0x130] sm:$0xff] %v2319_v0  ;;  %674 = vst [vmem:[#allocation2 + $0x138] sm:$0xff] %v2319_v0 }
  0xf6   : > { %675 = vst [vmem:[#allocation2 + $0x140] sm:$0xff] %v2319_v0  ;;  %676 = vst [vmem:[#allocation2 + $0x148] sm:$0xff] %v2319_v0 }
  0xf7   : > { %677 = vst [vmem:[#allocation2 + $0x150] sm:$0xff] %v2319_v0  ;;  %678 = vst [vmem:[#allocation2 + $0x158] sm:$0xff] %v2319_v0 }
  0xf8   : > { %679 = vst [vmem:[#allocation2 + $0x160] sm:$0xff] %v2319_v0  ;;  %680 = vst [vmem:[#allocation2 + $0x168] sm:$0xff] %v2319_v0 }
  0xf9   : > { %681 = vst [vmem:[#allocation2 + $0x170] sm:$0xff] %v2319_v0  ;;  %682 = vst [vmem:[#allocation2 + $0x178] sm:$0xff] %v2319_v0 }
  0xfa   : > { %683 = vst [vmem:[#allocation2 + $0x180] sm:$0xff] %v2319_v0  ;;  %684 = vst [vmem:[#allocation2 + $0x188] sm:$0xff] %v2319_v0 }
  0xfb   : > { %685 = vst [vmem:[#allocation2 + $0x190] sm:$0xff] %v2319_v0  ;;  %686 = vst [vmem:[#allocation2 + $0x198] sm:$0xff] %v2319_v0 }
  0xfc   : > { %687 = vst [vmem:[#allocation2 + $0x1a0] sm:$0xff] %v2319_v0  ;;  %688 = vst [vmem:[#allocation2 + $0x1a8] sm:$0xff] %v2319_v0 }
  0xfd   : > { %689 = vst [vmem:[#allocation2 + $0x1b0] sm:$0xff] %v2319_v0  ;;  %690 = vst [vmem:[#allocation2 + $0x1b8] sm:$0xff] %v2319_v0 }
  0xfe   : > { %691 = vst [vmem:[#allocation2 + $0x1c0] sm:$0xff] %v2319_v0  ;;  %692 = vst [vmem:[#allocation2 + $0x1c8] sm:$0xff] %v2319_v0 }
  0xff   : > { %693 = vst [vmem:[#allocation2 + $0x1d0] sm:$0xff] %v2319_v0  ;;  %694 = vst [vmem:[#allocation2 + $0x1d8] sm:$0xff] %v2319_v0 }
 0x100   : > { %695 = vst [vmem:[#allocation2 + $0x1e0] sm:$0xff] %v2319_v0  ;;  %696 = vst [vmem:[#allocation2 + $0x1e8] sm:$0xff] %v2319_v0 }
 0x101   : > { %697 = vst [vmem:[#allocation2 + $0x1f0] sm:$0xff] %v2319_v0  ;;  %698 = vst [vmem:[#allocation2 + $0x1f8] sm:$0xff] %v2319_v0 }
 0x102 PF: > { %v828_v1 = vld [vmem:[%s2880_s15 + $0x8] sm:$0xff]  ;;  %v830_v2 = vld [vmem:[%s2880_s15 + $0x18] sm:$0xff]  ;;  %v827_v3 = vld [vmem:[%s2880_s15] sm:$0xff]  ;;  %s3437_s12 = sld [smem:[#allocation16_spill]] }
 0x103   : > { %v1832_v4 = vpack.c.bf16 %v830_v2, %v828_v1  ;;  %v829_v5 = vld [vmem:[%s2880_s15 + $0x10] sm:$0xff]  ;;  %v832_v6 = vld [vmem:[%s2880_s15 + $0x28] sm:$0xff]  ;;  %v834_v7 = vld [vmem:[%s2880_s15 + $0x38] sm:$0xff] }
 0x104   : > { %v1834_v8 = vpack.c.bf16 %v829_v5, %v827_v3  ;;  %v1836_v9 = vpack.c.bf16 %v834_v7, %v832_v6  ;;  %v831_v10 = vld [vmem:[%s2880_s15 + $0x20] sm:$0xff]  ;;  %v833_v11 = vld [vmem:[%s2880_s15 + $0x30] sm:$0xff]  ;;  %v836_v12 = vld [vmem:[%s2880_s15 + $0x48] sm:$0xff] }
 0x105   : > { %1833 = vmatprep.subr.bf16.mxu0 %v1832_v4  ;;  %1896 = vmatprep.subr.bf16.mxu1 %v1832_v4  ;;  %v838_v13 = vld [vmem:[%s2880_s15 + $0x58] sm:$0xff]  ;;  %v1838_v14 = vpack.c.bf16 %v833_v11, %v831_v10  ;;  %v835_v16 = vld [vmem:[%s2880_s15 + $0x40] sm:$0xff]  ;;  %v837_v17 = vld [vmem:[%s2880_s15 + $0x50] sm:$0xff] }
 0x106   : > { %1835 = vmatpush1.bf16.xpose.msra.mxu0 %v1834_v8  ;;  %1912 = vmatpush1.bf16.xpose.msra.mxu1 %v1834_v8  ;;  %v1840_v15 = vpack.c.bf16 %v838_v13, %v836_v12  ;;  %v840_v18 = vld [vmem:[%s2880_s15 + $0x68] sm:$0xff]  ;;  %v842_v19 = vld [vmem:[%s2880_s15 + $0x78] sm:$0xff]  ;;  %v1842_v20 = vpack.c.bf16 %v837_v17, %v835_v16  ;;  %v839_v22 = vld [vmem:[%s2880_s15 + $0x60] sm:$0xff] }
 0x107   : > { %1837 = vmatprep.subr.bf16.mxu0 %v1836_v9  ;;  %1897 = vmatprep.subr.bf16.mxu1 %v1836_v9  ;;  %v1844_v21 = vpack.c.bf16 %v842_v19, %v840_v18  ;;  %v841_v23 = vld [vmem:[%s2880_s15 + $0x70] sm:$0xff]  ;;  %v764_v24 = vld [vmem:[%s2878_s26 + $0x8] sm:$0xff]  ;;  %v846_v27 = vld [vmem:[%s2880_s15 + $0x98] sm:$0xff] }
 0x108   : > { %v796_v25 = vld [vmem:[%s2878_s26 + $0x108] sm:$0xff]  ;;  %955 = vmatprep.mubr.f32.mxu0 %v764_v24  ;;  %v1846_v28 = vpack.c.bf16 %v841_v23, %v839_v22  ;;  %v843_v30 = vld [vmem:[%s2880_s15 + $0x80] sm:$0xff]  ;;  %v845_v31 = vld [vmem:[%s2880_s15 + $0x90] sm:$0xff]  ;;  %p1819_p11 = scmp.ne.s32.totalorder %s3437_s12, 1 }
 0x109   : > { %v844_v26 = vld [vmem:[%s2880_s15 + $0x88] sm:$0xff]  ;;  %1051 = vmatprep.mubr.f32.mxu1 %v796_v25  ;;  %v850_v33 = vld [vmem:[%s2880_s15 + $0xb8] sm:$0xff]  ;;  %v1850_v34 = vpack.c.bf16 %v845_v31, %v843_v30  ;;  %v847_v36 = vld [vmem:[%s2880_s15 + $0xa0] sm:$0xff] }
 0x10a   : > { %v1848_v29 = vpack.c.bf16 %v846_v27, %v844_v26  ;;  %v848_v32 = vld [vmem:[%s2880_s15 + $0xa8] sm:$0xff]  ;;  %v849_v37 = vld [vmem:[%s2880_s15 + $0xb0] sm:$0xff]  ;;  %v854_v39 = vld [vmem:[%s2880_s15 + $0xd8] sm:$0xff] }
 0x10b   : > { %v1852_v35 = vpack.c.bf16 %v850_v33, %v848_v32  ;;  %v852_v38 = vld [vmem:[%s2880_s15 + $0xc8] sm:$0xff]  ;;  %v1854_v40 = vpack.c.bf16 %v849_v37, %v847_v36  ;;  %v851_v42 = vld [vmem:[%s2880_s15 + $0xc0] sm:$0xff]  ;;  %v853_v43 = vld [vmem:[%s2880_s15 + $0xd0] sm:$0xff] }
 0x10c   : > { %v1856_v41 = vpack.c.bf16 %v854_v39, %v852_v38  ;;  %v856_v44 = vld [vmem:[%s2880_s15 + $0xe8] sm:$0xff]  ;;  %v858_v45 = vld [vmem:[%s2880_s15 + $0xf8] sm:$0xff]  ;;  %v1858_v46 = vpack.c.bf16 %v853_v43, %v851_v42  ;;  %v855_v48 = vld [vmem:[%s2880_s15 + $0xe0] sm:$0xff] }
 0x10d   : > { %v1860_v47 = vpack.c.bf16 %v858_v45, %v856_v44  ;;  %v857_v49 = vld [vmem:[%s2880_s15 + $0xf0] sm:$0xff]  ;;  %v860_v50 = vld [vmem:[%s2880_s15 + $0x108] sm:$0xff]  ;;  %v862_v51 = vld [vmem:[%s2880_s15 + $0x118] sm:$0xff] }
 0x10e   : > { %1839 = vmatpush1.bf16.xpose.msra.mxu0 %v1838_v14  ;;  %1913 = vmatpush1.bf16.xpose.msra.mxu1 %v1838_v14  ;;  %v1862_v52 = vpack.c.bf16 %v857_v49, %v855_v48  ;;  %v1864_v53 = vpack.c.bf16 %v862_v51, %v860_v50  ;;  %v859_v54 = vld [vmem:[%s2880_s15 + $0x100] sm:$0xff]  ;;  %v861_v55 = vld [vmem:[%s2880_s15 + $0x110] sm:$0xff]  ;;  %v864_v56 = vld [vmem:[%s2880_s15 + $0x128] sm:$0xff] }
 0x10f   : > { %1841 = vmatprep.subr.bf16.mxu0 %v1840_v15  ;;  %1898 = vmatprep.subr.bf16.mxu1 %v1840_v15  ;;  %v866_v57 = vld [vmem:[%s2880_s15 + $0x138] sm:$0xff]  ;;  %v1866_v58 = vpack.c.bf16 %v861_v55, %v859_v54  ;;  %v863_v60 = vld [vmem:[%s2880_s15 + $0x120] sm:$0xff]  ;;  %v865_v61 = vld [vmem:[%s2880_s15 + $0x130] sm:$0xff] }
 0x110   : > { %v1868_v59 = vpack.c.bf16 %v866_v57, %v864_v56  ;;  %v868_v62 = vld [vmem:[%s2880_s15 + $0x148] sm:$0xff]  ;;  %v870_v63 = vld [vmem:[%s2880_s15 + $0x158] sm:$0xff]  ;;  %v1870_v0 = vpack.c.bf16 %v865_v61, %v863_v60  ;;  %v867_v2 = vld [vmem:[%s2880_s15 + $0x140] sm:$0xff] }
 0x111   : > { %v1872_v1 = vpack.c.bf16 %v870_v63, %v868_v62  ;;  %v869_v3 = vld [vmem:[%s2880_s15 + $0x150] sm:$0xff]  ;;  %v872_v4 = vld [vmem:[%s2880_s15 + $0x168] sm:$0xff]  ;;  %v874_v5 = vld [vmem:[%s2880_s15 + $0x178] sm:$0xff] }
 0x112   : > { %v1874_v6 = vpack.c.bf16 %v869_v3, %v867_v2  ;;  %v1876_v7 = vpack.c.bf16 %v874_v5, %v872_v4  ;;  %v871_v8 = vld [vmem:[%s2880_s15 + $0x160] sm:$0xff]  ;;  %v873_v9 = vld [vmem:[%s2880_s15 + $0x170] sm:$0xff]  ;;  %v876_v10 = vld [vmem:[%s2880_s15 + $0x188] sm:$0xff] }
 0x113   : > { %v878_v11 = vld [vmem:[%s2880_s15 + $0x198] sm:$0xff]  ;;  %v1878_v12 = vpack.c.bf16 %v873_v9, %v871_v8  ;;  %v875_v14 = vld [vmem:[%s2880_s15 + $0x180] sm:$0xff]  ;;  %v877_v15 = vld [vmem:[%s2880_s15 + $0x190] sm:$0xff] }
 0x114   : > { %v1880_v13 = vpack.c.bf16 %v878_v11, %v876_v10  ;;  %v880_v16 = vld [vmem:[%s2880_s15 + $0x1a8] sm:$0xff]  ;;  %v882_v17 = vld [vmem:[%s2880_s15 + $0x1b8] sm:$0xff]  ;;  %v1882_v18 = vpack.c.bf16 %v877_v15, %v875_v14  ;;  %v883_v26 = vld [vmem:[%s2880_s15 + $0x1c0] sm:$0xff] }
 0x115   : > { %v1884_v19 = vpack.c.bf16 %v882_v17, %v880_v16  ;;  %v884_v22 = vld [vmem:[%s2880_s15 + $0x1c8] sm:$0xff]  ;;  %v886_v23 = vld [vmem:[%s2880_s15 + $0x1d8] sm:$0xff]  ;;  %v885_v27 = vld [vmem:[%s2880_s15 + $0x1d0] sm:$0xff] }
 0x116   : > { %1843 = vmatpush1.bf16.xpose.msra.mxu0 %v1842_v20  ;;  %1914 = vmatpush1.bf16.xpose.msra.mxu1 %v1842_v20  ;;  %v879_v20 = vld [vmem:[%s2880_s15 + $0x1a0] sm:$0xff]  ;;  %v1888_v25 = vpack.c.bf16 %v886_v23, %v884_v22  ;;  %v1890_v30 = vpack.c.bf16 %v885_v27, %v883_v26  ;;  %v889_v33 = vld [vmem:[%s2880_s15 + $0x1f0] sm:$0xff]  ;;  %v766_v37 = vld [vmem:[%s2878_s26 + $0x18] sm:$0xff] }
 0x117   : > { %1845 = vmatprep.subr.bf16.mxu0 %v1844_v21  ;;  %1899 = vmatprep.subr.bf16.mxu1 %v1844_v21  ;;  %v881_v21 = vld [vmem:[%s2880_s15 + $0x1b0] sm:$0xff]  ;;  %v887_v32 = vld [vmem:[%s2880_s15 + $0x1e0] sm:$0xff]  ;;  %v798_v38 = vld [vmem:[%s2878_s26 + $0x118] sm:$0xff] }
 0x118   : > { %v1886_v24 = vpack.c.bf16 %v881_v21, %v879_v20  ;;  %v795_v36 = vld [vmem:[%s2878_s26 + $0x100] sm:$0xff]  ;;  %v765_v39 = vld [vmem:[%s2878_s26 + $0x10] sm:$0xff]  ;;  %v800_v42 = vld [vmem:[%s2878_s26 + $0x128] sm:$0xff] }
 0x119   : > { %v767_v43 = vld [vmem:[%s2878_s26 + $0x20] sm:$0xff]  ;;  %v770_v45 = vld [vmem:[%s2878_s26 + $0x38] sm:$0xff]  ;;  %v801_v48 = vld [vmem:[%s2878_s26 + $0x130] sm:$0xff] }
 0x11a   : > { %v799_v44 = vld [vmem:[%s2878_s26 + $0x120] sm:$0xff]  ;;  %v772_v49 = vld [vmem:[%s2878_s26 + $0x48] sm:$0xff]  ;;  %v806_v54 = vld [vmem:[%s2878_s26 + $0x158] sm:$0xff] }
 0x11b   : > { %v804_v50 = vld [vmem:[%s2878_s26 + $0x148] sm:$0xff]  ;;  %v771_v51 = vld [vmem:[%s2878_s26 + $0x40] sm:$0xff]  ;;  %v773_v55 = vld [vmem:[%s2878_s26 + $0x50] sm:$0xff] }
 0x11c   : > { %v805_v56 = vld [vmem:[%s2878_s26 + $0x150] sm:$0xff]  ;;  %v776_v57 = vld [vmem:[%s2878_s26 + $0x68] sm:$0xff]  ;;  %v807_v60 = vld [vmem:[%s2878_s26 + $0x160] sm:$0xff] }
 0x11d   : > { %v778_v61 = vld [vmem:[%s2878_s26 + $0x78] sm:$0xff]  ;;  %v777_v63 = vld [vmem:[%s2878_s26 + $0x70] sm:$0xff]  ;;  %v812_v2 = vld [vmem:[%s2878_s26 + $0x188] sm:$0xff] }
 0x11e   : > { %1847 = vmatpush1.bf16.xpose.msra.mxu0 %v1846_v28  ;;  %1915 = vmatpush1.bf16.xpose.msra.mxu1 %v1846_v28  ;;  %v888_v28 = vld [vmem:[%s2880_s15 + $0x1e8] sm:$0xff]  ;;  %v810_v62 = vld [vmem:[%s2878_s26 + $0x178] sm:$0xff]  ;;  %v779_v3 = vld [vmem:[%s2878_s26 + $0x80] sm:$0xff] }
 0x11f   : > { %1849 = vmatprep.subr.bf16.mxu0 %v1848_v29  ;;  %1900 = vmatprep.subr.bf16.mxu1 %v1848_v29  ;;  %v890_v29 = vld [vmem:[%s2880_s15 + $0x1f8] sm:$0xff]  ;;  %v811_v4 = vld [vmem:[%s2878_s26 + $0x180] sm:$0xff]  ;;  %v813_v8 = vld [vmem:[%s2878_s26 + $0x190] sm:$0xff] }
 0x120   : > { %v1892_v31 = vpack.c.bf16 %v890_v29, %v888_v28  ;;  %v782_v5 = vld [vmem:[%s2878_s26 + $0x98] sm:$0xff]  ;;  %v784_v9 = vld [vmem:[%s2878_s26 + $0xa8] sm:$0xff]  ;;  %v783_v11 = vld [vmem:[%s2878_s26 + $0xa0] sm:$0xff] }
 0x121   : > { %v816_v10 = vld [vmem:[%s2878_s26 + $0x1a8] sm:$0xff]  ;;  %v818_v14 = vld [vmem:[%s2878_s26 + $0x1b8] sm:$0xff]  ;;  %v785_v15 = vld [vmem:[%s2878_s26 + $0xb0] sm:$0xff] }
 0x122   : > { %v817_v16 = vld [vmem:[%s2878_s26 + $0x1b0] sm:$0xff]  ;;  %v788_v17 = vld [vmem:[%s2878_s26 + $0xc8] sm:$0xff]  ;;  %v819_v20 = vld [vmem:[%s2878_s26 + $0x1c0] sm:$0xff] }
 0x123   : > { %v790_v21 = vld [vmem:[%s2878_s26 + $0xd8] sm:$0xff]  ;;  %v789_v23 = vld [vmem:[%s2878_s26 + $0xd0] sm:$0xff]  ;;  %v824_v26 = vld [vmem:[%s2878_s26 + $0x1e8] sm:$0xff] }
 0x124   : > { %v822_v22 = vld [vmem:[%s2878_s26 + $0x1d8] sm:$0xff]  ;;  %v791_v27 = vld [vmem:[%s2878_s26 + $0xe0] sm:$0xff] }
 0x125   : > { %v823_v28 = vld [vmem:[%s2878_s26 + $0x1e0] sm:$0xff]  ;;  %v794_v29 = vld [vmem:[%s2878_s26 + $0xf8] sm:$0xff] }
 0x126   : > { %1851 = vmatpush1.bf16.xpose.msra.mxu0 %v1850_v34  ;;  %1916 = vmatpush1.bf16.xpose.msra.mxu1 %v1850_v34  ;;  %v1894_v34 = vpack.c.bf16 %v889_v33, %v887_v32  ;;  %v825_v32 = vld [vmem:[%s2878_s26 + $0x1f0] sm:$0xff]  ;;  %v699_v33 = vld [vmem:[#allocation2] sm:$0xff] }
 0x127   : > { %1853 = vmatprep.subr.bf16.mxu0 %v1852_v35  ;;  %1901 = vmatprep.subr.bf16.mxu1 %v1852_v35  ;;  %v763_v35 = vld [vmem:[%s2878_s26] sm:$0xff] }
 0x12e   : > { %1855 = vmatpush1.bf16.xpose.msra.mxu0 %v1854_v40  ;;  %1917 = vmatpush1.bf16.xpose.msra.mxu1 %v1854_v40  ;;  %v797_v40 = vld [vmem:[%s2878_s26 + $0x110] sm:$0xff] }
 0x12f   : > { %1857 = vmatprep.subr.bf16.mxu0 %v1856_v41  ;;  %1902 = vmatprep.subr.bf16.mxu1 %v1856_v41  ;;  %v768_v41 = vld [vmem:[%s2878_s26 + $0x28] sm:$0xff] }
 0x136   : > { %1859 = vmatpush1.bf16.xpose.msra.mxu0 %v1858_v46  ;;  %1918 = vmatpush1.bf16.xpose.msra.mxu1 %v1858_v46  ;;  %v802_v46 = vld [vmem:[%s2878_s26 + $0x138] sm:$0xff] }
 0x137   : > { %1861 = vmatprep.subr.bf16.mxu0 %v1860_v47  ;;  %1903 = vmatprep.subr.bf16.mxu1 %v1860_v47  ;;  %v769_v47 = vld [vmem:[%s2878_s26 + $0x30] sm:$0xff] }
 0x13e   : > { %1863 = vmatpush1.bf16.xpose.msra.mxu0 %v1862_v52  ;;  %1919 = vmatpush1.bf16.xpose.msra.mxu1 %v1862_v52  ;;  %v803_v52 = vld [vmem:[%s2878_s26 + $0x140] sm:$0xff] }
 0x13f   : > { %1865 = vmatprep.subr.bf16.mxu0 %v1864_v53  ;;  %1904 = vmatprep.subr.bf16.mxu1 %v1864_v53  ;;  %v774_v53 = vld [vmem:[%s2878_s26 + $0x58] sm:$0xff] }
 0x146   : > { %1867 = vmatpush1.bf16.xpose.msra.mxu0 %v1866_v58  ;;  %1920 = vmatpush1.bf16.xpose.msra.mxu1 %v1866_v58  ;;  %v808_v58 = vld [vmem:[%s2878_s26 + $0x168] sm:$0xff] }
 0x147   : > { %1869 = vmatprep.subr.bf16.mxu0 %v1868_v59  ;;  %1905 = vmatprep.subr.bf16.mxu1 %v1868_v59  ;;  %v775_v59 = vld [vmem:[%s2878_s26 + $0x60] sm:$0xff] }
 0x14e   : > { %1871 = vmatpush1.bf16.xpose.msra.mxu0 %v1870_v0  ;;  %1921 = vmatpush1.bf16.xpose.msra.mxu1 %v1870_v0  ;;  %v809_v0 = vld [vmem:[%s2878_s26 + $0x170] sm:$0xff] }
 0x14f   : > { %1873 = vmatprep.subr.bf16.mxu0 %v1872_v1  ;;  %1906 = vmatprep.subr.bf16.mxu1 %v1872_v1  ;;  %v780_v1 = vld [vmem:[%s2878_s26 + $0x88] sm:$0xff] }
 0x156   : > { %1875 = vmatpush1.bf16.xpose.msra.mxu0 %v1874_v6  ;;  %1922 = vmatpush1.bf16.xpose.msra.mxu1 %v1874_v6  ;;  %v814_v6 = vld [vmem:[%s2878_s26 + $0x198] sm:$0xff] }
 0x157   : > { %1877 = vmatprep.subr.bf16.mxu0 %v1876_v7  ;;  %1907 = vmatprep.subr.bf16.mxu1 %v1876_v7  ;;  %v781_v7 = vld [vmem:[%s2878_s26 + $0x90] sm:$0xff] }
 0x15e   : > { %1879 = vmatpush1.bf16.xpose.msra.mxu0 %v1878_v12  ;;  %1923 = vmatpush1.bf16.xpose.msra.mxu1 %v1878_v12  ;;  %v815_v12 = vld [vmem:[%s2878_s26 + $0x1a0] sm:$0xff] }
 0x15f   : > { %1881 = vmatprep.subr.bf16.mxu0 %v1880_v13  ;;  %1908 = vmatprep.subr.bf16.mxu1 %v1880_v13  ;;  %v786_v13 = vld [vmem:[%s2878_s26 + $0xb8] sm:$0xff] }
 0x166   : > { %1883 = vmatpush1.bf16.xpose.msra.mxu0 %v1882_v18  ;;  %1924 = vmatpush1.bf16.xpose.msra.mxu1 %v1882_v18  ;;  %v820_v18 = vld [vmem:[%s2878_s26 + $0x1c8] sm:$0xff] }
 0x167   : > { %1885 = vmatprep.subr.bf16.mxu0 %v1884_v19  ;;  %1909 = vmatprep.subr.bf16.mxu1 %v1884_v19  ;;  %v787_v19 = vld [vmem:[%s2878_s26 + $0xc0] sm:$0xff] }
 0x16e   : > { %1887 = vmatpush1.bf16.xpose.msra.mxu0 %v1886_v24  ;;  %1925 = vmatpush1.bf16.xpose.msra.mxu1 %v1886_v24  ;;  %v821_v24 = vld [vmem:[%s2878_s26 + $0x1d0] sm:$0xff] }
 0x16f   : > { %1889 = vmatprep.subr.bf16.mxu0 %v1888_v25  ;;  %1910 = vmatprep.subr.bf16.mxu1 %v1888_v25  ;;  %v792_v25 = vld [vmem:[%s2878_s26 + $0xe8] sm:$0xff] }
 0x176   : > { %1891 = vmatpush1.bf16.xpose.msra.mxu0 %v1890_v30  ;;  %1926 = vmatpush1.bf16.xpose.msra.mxu1 %v1890_v30  ;;  %v826_v30 = vld [vmem:[%s2878_s26 + $0x1f8] sm:$0xff] }
 0x177   : > { %1893 = vmatprep.subr.bf16.mxu0 %v1892_v31  ;;  %1911 = vmatprep.subr.bf16.mxu1 %v1892_v31  ;;  %v793_v31 = vld [vmem:[%s2878_s26 + $0xf0] sm:$0xff] }
 0x17e   : > { %1895 = vmatpush1.bf16.xpose.msra.mxu0 %v1894_v34  ;;  %1927 = vmatpush1.bf16.xpose.msra.mxu1 %v1894_v34  ;;  %v731_v34 = vld [vmem:[#allocation2 + $0x100] sm:$0xff] }
 0x185   : > { %956 = vmatmul.mubr.f32.vlgmr.msra.gmra.mrb[0].mxu0 %v763_v35  ;;  %1052 = vmatmul.mubr.f32.vlgmr.msra.gmra.mrb[0].mxu1 %v795_v36  ;;  %v700_v35 = vld [vmem:[#allocation2 + $0x8] sm:$0xff] }
 0x186   : > { %961 = vmatprep.mubr.f32.mxu0 %v766_v37  ;;  %1057 = vmatprep.mubr.f32.mxu1 %v798_v38  ;;  %v732_v36 = vld [vmem:[#allocation2 + $0x108] sm:$0xff] }
 0x189   : > { %962 = vmatmul.mubr.f32.gmra.mrb[2].mxu0 %v765_v39  ;;  %1058 = vmatmul.mubr.f32.gmra.mrb[2].mxu1 %v797_v40 }
 0x18a   : > { %967 = vmatprep.mubr.f32.mxu0 %v768_v41  ;;  %1063 = vmatprep.mubr.f32.mxu1 %v800_v42 }
 0x18d   : > { %968 = vmatmul.mubr.f32.gmra.mrb[4].mxu0 %v767_v43  ;;  %1064 = vmatmul.mubr.f32.gmra.mrb[4].mxu1 %v799_v44 }
 0x18e   : > { %973 = vmatprep.mubr.f32.mxu0 %v770_v45  ;;  %1069 = vmatprep.mubr.f32.mxu1 %v802_v46  ;;  %v701_v45 = vld [vmem:[#allocation2 + $0x10] sm:$0xff] }
 0x18f   : > { %v733_v46 = vld [vmem:[#allocation2 + $0x110] sm:$0xff] }
 0x191   : > { %974 = vmatmul.mubr.f32.gmra.mrb[6].mxu0 %v769_v47  ;;  %1070 = vmatmul.mubr.f32.gmra.mrb[6].mxu1 %v801_v48  ;;  %v702_v47 = vld [vmem:[#allocation2 + $0x18] sm:$0xff] }
 0x192   : > { %979 = vmatprep.mubr.f32.mxu0 %v772_v49  ;;  %1075 = vmatprep.mubr.f32.mxu1 %v804_v50  ;;  %v734_v48 = vld [vmem:[#allocation2 + $0x118] sm:$0xff] }
 0x195   : > { %980 = vmatmul.mubr.f32.gmra.mrb[8].mxu0 %v771_v51  ;;  %1076 = vmatmul.mubr.f32.gmra.mrb[8].mxu1 %v803_v52 }
 0x196   : > { %985 = vmatprep.mubr.f32.mxu0 %v774_v53  ;;  %1081 = vmatprep.mubr.f32.mxu1 %v806_v54 }
 0x199   : > { %986 = vmatmul.mubr.f32.gmra.mrb[10].mxu0 %v773_v55  ;;  %1082 = vmatmul.mubr.f32.gmra.mrb[10].mxu1 %v805_v56 }
 0x19a   : > { %991 = vmatprep.mubr.f32.mxu0 %v776_v57  ;;  %1087 = vmatprep.mubr.f32.mxu1 %v808_v58  ;;  %v703_v57 = vld [vmem:[#allocation2 + $0x20] sm:$0xff] }
 0x19b   : > { %v735_v58 = vld [vmem:[#allocation2 + $0x120] sm:$0xff] }
 0x19d   : > { %992 = vmatmul.mubr.f32.gmra.mrb[12].mxu0 %v775_v59  ;;  %1088 = vmatmul.mubr.f32.gmra.mrb[12].mxu1 %v807_v60  ;;  %v704_v59 = vld [vmem:[#allocation2 + $0x28] sm:$0xff] }
 0x19e   : > { %997 = vmatprep.mubr.f32.mxu0 %v778_v61  ;;  %1093 = vmatprep.mubr.f32.mxu1 %v810_v62  ;;  %v736_v60 = vld [vmem:[#allocation2 + $0x128] sm:$0xff] }
 0x1a1   : > { %998 = vmatmul.mubr.f32.gmra.mrb[14].mxu0 %v777_v63  ;;  %1094 = vmatmul.mubr.f32.gmra.mrb[14].mxu1 %v809_v0 }
 0x1a2   : > { %1003 = vmatprep.mubr.f32.mxu0 %v780_v1  ;;  %1099 = vmatprep.mubr.f32.mxu1 %v812_v2 }
 0x1a5   : > { %1004 = vmatmul.mubr.f32.gmra.mrb[16].mxu0 %v779_v3  ;;  %1100 = vmatmul.mubr.f32.gmra.mrb[16].mxu1 %v811_v4 }
 0x1a6   : > { %1009 = vmatprep.mubr.f32.mxu0 %v782_v5  ;;  %1105 = vmatprep.mubr.f32.mxu1 %v814_v6  ;;  %v705_v5 = vld [vmem:[#allocation2 + $0x30] sm:$0xff] }
 0x1a7   : > { %v737_v6 = vld [vmem:[#allocation2 + $0x130] sm:$0xff] }
 0x1a9   : > { %1010 = vmatmul.mubr.f32.gmra.mrb[18].mxu0 %v781_v7  ;;  %1106 = vmatmul.mubr.f32.gmra.mrb[18].mxu1 %v813_v8  ;;  %v706_v7 = vld [vmem:[#allocation2 + $0x38] sm:$0xff] }
 0x1aa   : > { %1015 = vmatprep.mubr.f32.mxu0 %v784_v9  ;;  %1111 = vmatprep.mubr.f32.mxu1 %v816_v10  ;;  %v738_v8 = vld [vmem:[#allocation2 + $0x138] sm:$0xff] }
 0x1ad   : > { %1016 = vmatmul.mubr.f32.gmra.mrb[20].mxu0 %v783_v11  ;;  %1112 = vmatmul.mubr.f32.gmra.mrb[20].mxu1 %v815_v12 }
 0x1ae   : > { %1021 = vmatprep.mubr.f32.mxu0 %v786_v13  ;;  %1117 = vmatprep.mubr.f32.mxu1 %v818_v14 }
 0x1b1   : > { %1022 = vmatmul.mubr.f32.gmra.mrb[22].mxu0 %v785_v15  ;;  %1118 = vmatmul.mubr.f32.gmra.mrb[22].mxu1 %v817_v16 }
 0x1b2   : > { %1027 = vmatprep.mubr.f32.mxu0 %v788_v17  ;;  %1123 = vmatprep.mubr.f32.mxu1 %v820_v18  ;;  %v707_v17 = vld [vmem:[#allocation2 + $0x40] sm:$0xff] }
 0x1b3   : > { %v739_v18 = vld [vmem:[#allocation2 + $0x140] sm:$0xff] }
 0x1b5   : > { %1028 = vmatmul.mubr.f32.gmra.mrb[24].mxu0 %v787_v19  ;;  %1124 = vmatmul.mubr.f32.gmra.mrb[24].mxu1 %v819_v20  ;;  %v708_v19 = vld [vmem:[#allocation2 + $0x48] sm:$0xff] }
 0x1b6   : > { %1033 = vmatprep.mubr.f32.mxu0 %v790_v21  ;;  %1129 = vmatprep.mubr.f32.mxu1 %v822_v22  ;;  %v740_v20 = vld [vmem:[#allocation2 + $0x148] sm:$0xff] }
 0x1b9   : > { %1034 = vmatmul.mubr.f32.gmra.mrb[26].mxu0 %v789_v23  ;;  %1130 = vmatmul.mubr.f32.gmra.mrb[26].mxu1 %v821_v24 }
 0x1ba   : > { %1039 = vmatprep.mubr.f32.mxu0 %v792_v25  ;;  %1135 = vmatprep.mubr.f32.mxu1 %v824_v26 }
 0x1bd   : > { %1040 = vmatmul.mubr.f32.gmra.mrb[28].mxu0 %v791_v27  ;;  %1136 = vmatmul.mubr.f32.gmra.mrb[28].mxu1 %v823_v28 }
 0x1be   : > { %1045 = vmatprep.mubr.f32.mxu0 %v794_v29  ;;  %1141 = vmatprep.mubr.f32.mxu1 %v826_v30  ;;  %v709_v29 = vld [vmem:[#allocation2 + $0x50] sm:$0xff] }
 0x1bf   : > { %v741_v30 = vld [vmem:[#allocation2 + $0x150] sm:$0xff] }
 0x1c1   : > { %1046 = vmatmul.mubr.f32.gmra.mrb[30].mxu0 %v793_v31  ;;  %1142 = vmatmul.mubr.f32.gmra.mrb[30].mxu1 %v825_v32  ;;  %v710_v31 = vld [vmem:[#allocation2 + $0x58] sm:$0xff] }
 0x1c2   : > { %v742_v32 = vld [vmem:[#allocation2 + $0x158] sm:$0xff] }
 0x258   : > { %v957_v37 = vpop.f32.mrb[0].mxu0  ;;  %v1053_v38 = vpop.f32.mrb[0].mxu1 }
 0x259   : > { %v1148_v39 = vadd.f32 %v957_v37, %v699_v33  ;;  %v1180_v40 = vadd.f32 %v1053_v38, %v731_v34  ;;  %v959_v41 = vpop.f32.mrb[1].mxu0  ;;  %v1055_v42 = vpop.f32.mrb[1].mxu1 }
 0x25a   : > { %v1149_v43 = vadd.f32 %v959_v41, %v700_v35  ;;  %v1181_v44 = vadd.f32 %v1055_v42, %v732_v36  ;;  %v711_v41 = vld [vmem:[#allocation2 + $0x60] sm:$0xff] }
 0x25b   : > { %1212 = vst [vmem:[#allocation2] sm:$0xff] %v1148_v39  ;;  %1244 = vst [vmem:[#allocation2 + $0x100] sm:$0xff] %v1180_v40  ;;  %v743_v42 = vld [vmem:[#allocation2 + $0x160] sm:$0xff] }
 0x25c   : > { %1213 = vst [vmem:[#allocation2 + $0x8] sm:$0xff] %v1149_v43  ;;  %1245 = vst [vmem:[#allocation2 + $0x108] sm:$0xff] %v1181_v44  ;;  %v963_v49 = vpop.f32.mrb[2].mxu0  ;;  %v1059_v50 = vpop.f32.mrb[2].mxu1  ;;  %v712_v43 = vld [vmem:[#allocation2 + $0x68] sm:$0xff] }
 0x25d   : > { %v1150_v51 = vadd.f32 %v963_v49, %v701_v45  ;;  %v1182_v52 = vadd.f32 %v1059_v50, %v733_v46  ;;  %v965_v53 = vpop.f32.mrb[3].mxu0  ;;  %v1061_v54 = vpop.f32.mrb[3].mxu1  ;;  %v744_v44 = vld [vmem:[#allocation2 + $0x168] sm:$0xff] }
 0x25e   : > { %v1151_v55 = vadd.f32 %v965_v53, %v702_v47  ;;  %v1183_v56 = vadd.f32 %v1061_v54, %v734_v48  ;;  %v713_v53 = vld [vmem:[#allocation2 + $0x70] sm:$0xff] }
 0x25f   : > { %1214 = vst [vmem:[#allocation2 + $0x10] sm:$0xff] %v1150_v51  ;;  %1246 = vst [vmem:[#allocation2 + $0x110] sm:$0xff] %v1182_v52  ;;  %v745_v54 = vld [vmem:[#allocation2 + $0x170] sm:$0xff] }
 0x260   : > { %1215 = vst [vmem:[#allocation2 + $0x18] sm:$0xff] %v1151_v55  ;;  %1247 = vst [vmem:[#allocation2 + $0x118] sm:$0xff] %v1183_v56  ;;  %v969_v61 = vpop.f32.mrb[4].mxu0  ;;  %v1065_v62 = vpop.f32.mrb[4].mxu1  ;;  %v714_v55 = vld [vmem:[#allocation2 + $0x78] sm:$0xff] }
 0x261   : > { %v1152_v63 = vadd.f32 %v969_v61, %v703_v57  ;;  %v1184_v0 = vadd.f32 %v1065_v62, %v735_v58  ;;  %v971_v1 = vpop.f32.mrb[5].mxu0  ;;  %v1067_v2 = vpop.f32.mrb[5].mxu1  ;;  %v746_v56 = vld [vmem:[#allocation2 + $0x178] sm:$0xff] }
 0x262   : > { %v1153_v3 = vadd.f32 %v971_v1, %v704_v59  ;;  %v1185_v4 = vadd.f32 %v1067_v2, %v736_v60  ;;  %v715_v1 = vld [vmem:[#allocation2 + $0x80] sm:$0xff] }
 0x263   : > { %1216 = vst [vmem:[#allocation2 + $0x20] sm:$0xff] %v1152_v63  ;;  %1248 = vst [vmem:[#allocation2 + $0x120] sm:$0xff] %v1184_v0  ;;  %v747_v2 = vld [vmem:[#allocation2 + $0x180] sm:$0xff] }
 0x264   : > { %1217 = vst [vmem:[#allocation2 + $0x28] sm:$0xff] %v1153_v3  ;;  %1249 = vst [vmem:[#allocation2 + $0x128] sm:$0xff] %v1185_v4  ;;  %v975_v9 = vpop.f32.mrb[6].mxu0  ;;  %v1071_v10 = vpop.f32.mrb[6].mxu1  ;;  %v716_v3 = vld [vmem:[#allocation2 + $0x88] sm:$0xff] }
 0x265   : > { %v1154_v11 = vadd.f32 %v975_v9, %v705_v5  ;;  %v1186_v12 = vadd.f32 %v1071_v10, %v737_v6  ;;  %v977_v13 = vpop.f32.mrb[7].mxu0  ;;  %v1073_v14 = vpop.f32.mrb[7].mxu1  ;;  %v748_v4 = vld [vmem:[#allocation2 + $0x188] sm:$0xff] }
 0x266   : > { %v1155_v15 = vadd.f32 %v977_v13, %v706_v7  ;;  %v1187_v16 = vadd.f32 %v1073_v14, %v738_v8  ;;  %v717_v13 = vld [vmem:[#allocation2 + $0x90] sm:$0xff] }
 0x267   : > { %1218 = vst [vmem:[#allocation2 + $0x30] sm:$0xff] %v1154_v11  ;;  %1250 = vst [vmem:[#allocation2 + $0x130] sm:$0xff] %v1186_v12  ;;  %v749_v14 = vld [vmem:[#allocation2 + $0x190] sm:$0xff] }
 0x268   : > { %1219 = vst [vmem:[#allocation2 + $0x38] sm:$0xff] %v1155_v15  ;;  %1251 = vst [vmem:[#allocation2 + $0x138] sm:$0xff] %v1187_v16  ;;  %v981_v21 = vpop.f32.mrb[8].mxu0  ;;  %v1077_v22 = vpop.f32.mrb[8].mxu1  ;;  %v718_v15 = vld [vmem:[#allocation2 + $0x98] sm:$0xff] }
 0x269   : > { %v1156_v23 = vadd.f32 %v981_v21, %v707_v17  ;;  %v1188_v24 = vadd.f32 %v1077_v22, %v739_v18  ;;  %v983_v25 = vpop.f32.mrb[9].mxu0  ;;  %v1079_v26 = vpop.f32.mrb[9].mxu1  ;;  %v750_v16 = vld [vmem:[#allocation2 + $0x198] sm:$0xff] }
 0x26a   : > { %v1157_v27 = vadd.f32 %v983_v25, %v708_v19  ;;  %v1189_v28 = vadd.f32 %v1079_v26, %v740_v20  ;;  %v719_v25 = vld [vmem:[#allocation2 + $0xa0] sm:$0xff] }
 0x26b   : > { %1220 = vst [vmem:[#allocation2 + $0x40] sm:$0xff] %v1156_v23  ;;  %1252 = vst [vmem:[#allocation2 + $0x140] sm:$0xff] %v1188_v24  ;;  %v751_v26 = vld [vmem:[#allocation2 + $0x1a0] sm:$0xff] }
 0x26c   : > { %1221 = vst [vmem:[#allocation2 + $0x48] sm:$0xff] %v1157_v27  ;;  %1253 = vst [vmem:[#allocation2 + $0x148] sm:$0xff] %v1189_v28  ;;  %v987_v33 = vpop.f32.mrb[10].mxu0  ;;  %v1083_v34 = vpop.f32.mrb[10].mxu1  ;;  %v720_v27 = vld [vmem:[#allocation2 + $0xa8] sm:$0xff] }
 0x26d   : > { %v1158_v35 = vadd.f32 %v987_v33, %v709_v29  ;;  %v1190_v36 = vadd.f32 %v1083_v34, %v741_v30  ;;  %v989_v37 = vpop.f32.mrb[11].mxu0  ;;  %v1085_v38 = vpop.f32.mrb[11].mxu1  ;;  %v752_v28 = vld [vmem:[#allocation2 + $0x1a8] sm:$0xff] }
 0x26e   : > { %v1159_v39 = vadd.f32 %v989_v37, %v710_v31  ;;  %v1191_v40 = vadd.f32 %v1085_v38, %v742_v32  ;;  %v721_v37 = vld [vmem:[#allocation2 + $0xb0] sm:$0xff] }
 0x26f   : > { %1222 = vst [vmem:[#allocation2 + $0x50] sm:$0xff] %v1158_v35  ;;  %1254 = vst [vmem:[#allocation2 + $0x150] sm:$0xff] %v1190_v36  ;;  %v753_v38 = vld [vmem:[#allocation2 + $0x1b0] sm:$0xff] }
 0x270   : > { %1223 = vst [vmem:[#allocation2 + $0x58] sm:$0xff] %v1159_v39  ;;  %1255 = vst [vmem:[#allocation2 + $0x158] sm:$0xff] %v1191_v40  ;;  %v993_v45 = vpop.f32.mrb[12].mxu0  ;;  %v1089_v46 = vpop.f32.mrb[12].mxu1  ;;  %v722_v39 = vld [vmem:[#allocation2 + $0xb8] sm:$0xff] }
 0x271   : > { %v1160_v47 = vadd.f32 %v993_v45, %v711_v41  ;;  %v1192_v48 = vadd.f32 %v1089_v46, %v743_v42  ;;  %v995_v49 = vpop.f32.mrb[13].mxu0  ;;  %v1091_v50 = vpop.f32.mrb[13].mxu1  ;;  %v754_v40 = vld [vmem:[#allocation2 + $0x1b8] sm:$0xff] }
 0x272   : > { %v1161_v51 = vadd.f32 %v995_v49, %v712_v43  ;;  %v1193_v52 = vadd.f32 %v1091_v50, %v744_v44  ;;  %v723_v49 = vld [vmem:[#allocation2 + $0xc0] sm:$0xff] }
 0x273   : > { %1224 = vst [vmem:[#allocation2 + $0x60] sm:$0xff] %v1160_v47  ;;  %1256 = vst [vmem:[#allocation2 + $0x160] sm:$0xff] %v1192_v48  ;;  %v755_v50 = vld [vmem:[#allocation2 + $0x1c0] sm:$0xff] }
 0x274   : > { %1225 = vst [vmem:[#allocation2 + $0x68] sm:$0xff] %v1161_v51  ;;  %1257 = vst [vmem:[#allocation2 + $0x168] sm:$0xff] %v1193_v52  ;;  %v999_v57 = vpop.f32.mrb[14].mxu0  ;;  %v1095_v58 = vpop.f32.mrb[14].mxu1  ;;  %v724_v51 = vld [vmem:[#allocation2 + $0xc8] sm:$0xff] }
 0x275   : > { %v1162_v59 = vadd.f32 %v999_v57, %v713_v53  ;;  %v1194_v60 = vadd.f32 %v1095_v58, %v745_v54  ;;  %v1001_v61 = vpop.f32.mrb[15].mxu0  ;;  %v1097_v62 = vpop.f32.mrb[15].mxu1  ;;  %v756_v52 = vld [vmem:[#allocation2 + $0x1c8] sm:$0xff] }
 0x276   : > { %v1163_v63 = vadd.f32 %v1001_v61, %v714_v55  ;;  %v1195_v0 = vadd.f32 %v1097_v62, %v746_v56  ;;  %v725_v61 = vld [vmem:[#allocation2 + $0xd0] sm:$0xff] }
 0x277   : > { %1226 = vst [vmem:[#allocation2 + $0x70] sm:$0xff] %v1162_v59  ;;  %1258 = vst [vmem:[#allocation2 + $0x170] sm:$0xff] %v1194_v60  ;;  %v757_v62 = vld [vmem:[#allocation2 + $0x1d0] sm:$0xff] }
 0x278   : > { %1227 = vst [vmem:[#allocation2 + $0x78] sm:$0xff] %v1163_v63  ;;  %1259 = vst [vmem:[#allocation2 + $0x178] sm:$0xff] %v1195_v0  ;;  %v1005_v5 = vpop.f32.mrb[16].mxu0  ;;  %v1101_v6 = vpop.f32.mrb[16].mxu1  ;;  %v726_v63 = vld [vmem:[#allocation2 + $0xd8] sm:$0xff] }
 0x279   : > { %v1164_v7 = vadd.f32 %v1005_v5, %v715_v1  ;;  %v1196_v8 = vadd.f32 %v1101_v6, %v747_v2  ;;  %v1007_v9 = vpop.f32.mrb[17].mxu0  ;;  %v1103_v10 = vpop.f32.mrb[17].mxu1  ;;  %v758_v0 = vld [vmem:[#allocation2 + $0x1d8] sm:$0xff] }
 0x27a   : > { %v1165_v11 = vadd.f32 %v1007_v9, %v716_v3  ;;  %v1197_v12 = vadd.f32 %v1103_v10, %v748_v4  ;;  %v727_v9 = vld [vmem:[#allocation2 + $0xe0] sm:$0xff] }
 0x27b   : > { %1228 = vst [vmem:[#allocation2 + $0x80] sm:$0xff] %v1164_v7  ;;  %1260 = vst [vmem:[#allocation2 + $0x180] sm:$0xff] %v1196_v8  ;;  %v759_v10 = vld [vmem:[#allocation2 + $0x1e0] sm:$0xff] }
 0x27c   : > { %1229 = vst [vmem:[#allocation2 + $0x88] sm:$0xff] %v1165_v11  ;;  %1261 = vst [vmem:[#allocation2 + $0x188] sm:$0xff] %v1197_v12  ;;  %v1011_v17 = vpop.f32.mrb[18].mxu0  ;;  %v1107_v18 = vpop.f32.mrb[18].mxu1  ;;  %v728_v11 = vld [vmem:[#allocation2 + $0xe8] sm:$0xff] }
 0x27d   : > { %v1166_v19 = vadd.f32 %v1011_v17, %v717_v13  ;;  %v1198_v20 = vadd.f32 %v1107_v18, %v749_v14  ;;  %v1013_v21 = vpop.f32.mrb[19].mxu0  ;;  %v1109_v22 = vpop.f32.mrb[19].mxu1  ;;  %v760_v12 = vld [vmem:[#allocation2 + $0x1e8] sm:$0xff] }
 0x27e   : > { %v1167_v23 = vadd.f32 %v1013_v21, %v718_v15  ;;  %v1199_v24 = vadd.f32 %v1109_v22, %v750_v16  ;;  %v729_v21 = vld [vmem:[#allocation2 + $0xf0] sm:$0xff] }
 0x27f   : > { %1230 = vst [vmem:[#allocation2 + $0x90] sm:$0xff] %v1166_v19  ;;  %1262 = vst [vmem:[#allocation2 + $0x190] sm:$0xff] %v1198_v20  ;;  %v761_v22 = vld [vmem:[#allocation2 + $0x1f0] sm:$0xff] }
 0x280   : > { %1231 = vst [vmem:[#allocation2 + $0x98] sm:$0xff] %v1167_v23  ;;  %1263 = vst [vmem:[#allocation2 + $0x198] sm:$0xff] %v1199_v24  ;;  %v1017_v29 = vpop.f32.mrb[20].mxu0  ;;  %v1113_v30 = vpop.f32.mrb[20].mxu1  ;;  %v730_v23 = vld [vmem:[#allocation2 + $0xf8] sm:$0xff] }
 0x281   : > { %v1168_v31 = vadd.f32 %v1017_v29, %v719_v25  ;;  %v1200_v32 = vadd.f32 %v1113_v30, %v751_v26  ;;  %v1019_v33 = vpop.f32.mrb[21].mxu0  ;;  %v1115_v34 = vpop.f32.mrb[21].mxu1  ;;  %v762_v24 = vld [vmem:[#allocation2 + $0x1f8] sm:$0xff] }
 0x282   : > { %v1169_v35 = vadd.f32 %v1019_v33, %v720_v27  ;;  %v1201_v36 = vadd.f32 %v1115_v34, %v752_v28  ;;  %v1346_v33 = vlaneseq (!%p1819_p11) }
 0x283   : > { %1232 = vst [vmem:[#allocation2 + $0xa0] sm:$0xff] %v1168_v31  ;;  %1264 = vst [vmem:[#allocation2 + $0x1a0] sm:$0xff] %v1200_v32 }
 0x284   : > { %1233 = vst [vmem:[#allocation2 + $0xa8] sm:$0xff] %v1169_v35  ;;  %1265 = vst [vmem:[#allocation2 + $0x1a8] sm:$0xff] %v1201_v36  ;;  %v1023_v41 = vpop.f32.mrb[22].mxu0  ;;  %v1119_v42 = vpop.f32.mrb[22].mxu1  ;;  %v1347_v34 = vshrl.u32 (!%p1819_p11), %v1346_v33, 7  ;;  %v1280_v36 = vld [vmem:[#allocation2] sm:$0xff] (!%p1819_p11) }
 0x285   : > { %v1170_v43 = vadd.f32 %v1023_v41, %v721_v37  ;;  %v1202_v44 = vadd.f32 %v1119_v42, %v753_v38  ;;  %v1025_v45 = vpop.f32.mrb[23].mxu0  ;;  %v1121_v46 = vpop.f32.mrb[23].mxu1  ;;  %v1344_v35 = vld [vmem:[%s575_s18] sm:$0x3] (!%p1819_p11)  ;;  %v1281_v38 = vld [vmem:[#allocation2 + $0x8] sm:$0xff] (!%p1819_p11) }
 0x286   : > { %v1171_v47 = vadd.f32 %v1025_v45, %v722_v39  ;;  %v1203_v48 = vadd.f32 %v1121_v46, %v754_v40  ;;  %v1348_v37 = vsub.s32 (!%p1819_p11), 0, %v1347_v34  ;;  %v1352_v39 = vsub.s32 (!%p1819_p11), 1, %v1347_v34  ;;  %v1282_v40 = vld [vmem:[#allocation2 + $0x10] sm:$0xff] (!%p1819_p11)  ;;  %v1420_v41 = vld [vmem:[%s2892_s0] sm:$0xff] (!%p1819_p11)  ;;  %v1423_v45 = vld [vmem:[%s2892_s0 + $0x18] sm:$0xff] (!%p1819_p11) }
 0x287   : > { %1234 = vst [vmem:[#allocation2 + $0xb0] sm:$0xff] %v1170_v43  ;;  %1266 = vst [vmem:[#allocation2 + $0x1b0] sm:$0xff] %v1202_v44  ;;  %v1421_v42 = vld [vmem:[%s2892_s0 + $0x8] sm:$0xff] (!%p1819_p11)  ;;  %v1422_v43 = vld [vmem:[%s2892_s0 + $0x10] sm:$0xff] (!%p1819_p11) }
 0x288   : > { %1235 = vst [vmem:[#allocation2 + $0xb8] sm:$0xff] %v1171_v47  ;;  %1267 = vst [vmem:[#allocation2 + $0x1b8] sm:$0xff] %v1203_v48  ;;  %v1029_v53 = vpop.f32.mrb[24].mxu0  ;;  %v1125_v54 = vpop.f32.mrb[24].mxu1  ;;  %v1283_v44 = vld [vmem:[#allocation2 + $0x18] sm:$0xff] (!%p1819_p11)  ;;  %v1284_v46 = vld [vmem:[#allocation2 + $0x20] sm:$0xff] (!%p1819_p11)  ;;  %v3100_v47 = vrot.slane (!%p1819_p11), %v1344_v35, %v1348_v37  ;;  %v3102_v48 = vrot.slane (!%p1819_p11), %v1344_v35, %v1352_v39 }
 0x289   : > { %v1172_v55 = vadd.f32 %v1029_v53, %v723_v49  ;;  %v1204_v56 = vadd.f32 %v1125_v54, %v755_v50  ;;  %v1031_v57 = vpop.f32.mrb[25].mxu0  ;;  %v1127_v58 = vpop.f32.mrb[25].mxu1  ;;  %v1424_v49 = vld [vmem:[%s2892_s0 + $0x20] sm:$0xff] (!%p1819_p11)  ;;  %v1425_v53 = vld [vmem:[%s2892_s0 + $0x28] sm:$0xff] (!%p1819_p11)  ;;  %v1426_v54 = vld [vmem:[%s2892_s0 + $0x30] sm:$0xff] (!%p1819_p11) }
 0x28a   : > { %v1173_v59 = vadd.f32 %v1031_v57, %v724_v51  ;;  %v1205_v60 = vadd.f32 %v1127_v58, %v756_v52  ;;  %v1285_v50 = vld [vmem:[#allocation2 + $0x28] sm:$0xff] (!%p1819_p11)  ;;  %v1286_v51 = vld [vmem:[#allocation2 + $0x30] sm:$0xff] (!%p1819_p11)  ;;  %v1287_v52 = vld [vmem:[#allocation2 + $0x38] sm:$0xff] (!%p1819_p11)  ;;  %v1357_v57 = vadd.f32 (!%p1819_p11), %v3102_v48, %v1281_v38  ;;  %v1358_v58 = vadd.f32 (!%p1819_p11), %v3100_v47, %v1282_v40 }
 0x28b   : > { %1236 = vst [vmem:[#allocation2 + $0xc0] sm:$0xff] %v1172_v55  ;;  %1268 = vst [vmem:[#allocation2 + $0x1c0] sm:$0xff] %v1204_v56  ;;  %v1427_v55 = vld [vmem:[%s2892_s0 + $0x38] sm:$0xff] (!%p1819_p11)  ;;  %v1356_v56 = vadd.f32 (!%p1819_p11), %v3100_v47, %v1280_v36  ;;  %v1436_v35 = vld [vmem:[%s2892_s0 + $0x80] sm:$0xff] (!%p1819_p11) }
 0x28c   : > { %1237 = vst [vmem:[#allocation2 + $0xc8] sm:$0xff] %v1173_v59  ;;  %1269 = vst [vmem:[#allocation2 + $0x1c8] sm:$0xff] %v1205_v60  ;;  %v1035_v1 = vpop.f32.mrb[26].mxu0  ;;  %v1131_v2 = vpop.f32.mrb[26].mxu1  ;;  %v1359_v59 = vadd.f32 (!%p1819_p11), %v3102_v48, %v1283_v44  ;;  %v1288_v60 = vld [vmem:[#allocation2 + $0x40] sm:$0xff] (!%p1819_p11)  ;;  %v1437_v36 = vld [vmem:[%s2892_s0 + $0x88] sm:$0xff] (!%p1819_p11) }
 0x28d   : > { %v1174_v3 = vadd.f32 %v1035_v1, %v725_v61  ;;  %v1206_v4 = vadd.f32 %v1131_v2, %v757_v62  ;;  %v1037_v5 = vpop.f32.mrb[27].mxu0  ;;  %v1133_v6 = vpop.f32.mrb[27].mxu1  ;;  %v1289_v61 = vld [vmem:[#allocation2 + $0x48] sm:$0xff] (!%p1819_p11)  ;;  %v1290_v62 = vld [vmem:[#allocation2 + $0x50] sm:$0xff] (!%p1819_p11)  ;;  %v1362_v1 = vadd.f32 (!%p1819_p11), %v3100_v47, %v1286_v51  ;;  %v1363_v2 = vadd.f32 (!%p1819_p11), %v3102_v48, %v1287_v52  ;;  %v1299_v38 = vld [vmem:[#allocation2 + $0x98] sm:$0xff] (!%p1819_p11) }
 0x28e   : > { %v1175_v7 = vadd.f32 %v1037_v5, %v726_v63  ;;  %v1207_v8 = vadd.f32 %v1133_v6, %v758_v0  ;;  %v1360_v63 = vadd.f32 (!%p1819_p11), %v3100_v47, %v1284_v46  ;;  %v1361_v0 = vadd.f32 (!%p1819_p11), %v3102_v48, %v1285_v50  ;;  %v1430_v5 = vld [vmem:[%s2892_s0 + $0x50] sm:$0xff] (!%p1819_p11)  ;;  %v1439_v39 = vld [vmem:[%s2892_s0 + $0x98] sm:$0xff] (!%p1819_p11)  ;;  %v1301_v46 = vld [vmem:[#allocation2 + $0xa8] sm:$0xff] (!%p1819_p11) }
 0x28f   : > { %1238 = vst [vmem:[#allocation2 + $0xd0] sm:$0xff] %v1174_v3  ;;  %1270 = vst [vmem:[#allocation2 + $0x1d0] sm:$0xff] %v1206_v4  ;;  %v1428_v3 = vld [vmem:[%s2892_s0 + $0x40] sm:$0xff] (!%p1819_p11)  ;;  %v1429_v4 = vld [vmem:[%s2892_s0 + $0x48] sm:$0xff] (!%p1819_p11) }
 0x290   : > { %1239 = vst [vmem:[#allocation2 + $0xd8] sm:$0xff] %v1175_v7  ;;  %1271 = vst [vmem:[#allocation2 + $0x1d8] sm:$0xff] %v1207_v8  ;;  %v1041_v13 = vpop.f32.mrb[28].mxu0  ;;  %v1137_v14 = vpop.f32.mrb[28].mxu1  ;;  %v1291_v6 = vld [vmem:[#allocation2 + $0x58] sm:$0xff] (!%p1819_p11)  ;;  %v1292_v8 = vld [vmem:[#allocation2 + $0x60] sm:$0xff] (!%p1819_p11) }
 0x291   : > { %v1176_v15 = vadd.f32 %v1041_v13, %v727_v9  ;;  %v1208_v16 = vadd.f32 %v1137_v14, %v759_v10  ;;  %v1043_v17 = vpop.f32.mrb[29].mxu0  ;;  %v1139_v18 = vpop.f32.mrb[29].mxu1  ;;  %v1431_v7 = vld [vmem:[%s2892_s0 + $0x58] sm:$0xff] (!%p1819_p11)  ;;  %v1484_v9 = vadd.f32 (!%p1819_p11), %v1420_v41, %v1356_v56  ;;  %v1485_v10 = vadd.f32 (!%p1819_p11), %v1421_v42, %v1357_v57  ;;  %v1432_v13 = vld [vmem:[%s2892_s0 + $0x60] sm:$0xff] (!%p1819_p11)  ;;  %v1438_v37 = vld [vmem:[%s2892_s0 + $0x90] sm:$0xff] (!%p1819_p11) }
 0x292   : > { %v1177_v19 = vadd.f32 %v1043_v17, %v728_v11  ;;  %v1209_v20 = vadd.f32 %v1139_v18, %v760_v12  ;;  %1279 = sbr.rel (%p1819_p11) target bundleno = 704 (0x2c0), region = 98  ;;  %v1486_v11 = vadd.f32 (!%p1819_p11), %v1422_v43, %v1358_v58  ;;  %v1487_v12 = vadd.f32 (!%p1819_p11), %v1423_v45, %v1359_v59  ;;  %v1293_v14 = vld [vmem:[#allocation2 + $0x68] sm:$0xff] (!%p1819_p11)  ;;  %v1300_v44 = vld [vmem:[#allocation2 + $0xa0] sm:$0xff] (!%p1819_p11) }
 0x293   : > { %1240 = vst [vmem:[#allocation2 + $0xe0] sm:$0xff] %v1176_v15  ;;  %1272 = vst [vmem:[#allocation2 + $0x1e0] sm:$0xff] %v1208_v16  ;;  %v1294_v15 = vld [vmem:[#allocation2 + $0x70] sm:$0xff] (!%p1819_p11)  ;;  %v1295_v16 = vld [vmem:[#allocation2 + $0x78] sm:$0xff] (!%p1819_p11)  ;;  %v1488_v17 = vadd.f32 (!%p1819_p11), %v1424_v49, %v1360_v63  ;;  %v1489_v18 = vadd.f32 (!%p1819_p11), %v1425_v53, %v1361_v0  ;;  %v1375_v59 = vadd.f32 (!%p1819_p11), %v3102_v48, %v1299_v38 }
 0x294   : > { %1241 = vst [vmem:[#allocation2 + $0xe8] sm:$0xff] %v1177_v19  ;;  %1273 = vst [vmem:[#allocation2 + $0x1e8] sm:$0xff] %v1209_v20  ;;  %v1047_v25 = vpop.f32.mrb[30].mxu0  ;;  %v1143_v26 = vpop.f32.mrb[30].mxu1  ;;  %v1490_v19 = vadd.f32 (!%p1819_p11), %v1426_v54, %v1362_v1  ;;  %v1491_v20 = vadd.f32 (!%p1819_p11), %v1427_v55, %v1363_v2  ;;  %v1370_v33 = vadd.f32 (!%p1819_p11), %v3100_v47, %v1294_v15  ;;  %v1440_v45 = vld [vmem:[%s2892_s0 + $0xa0] sm:$0xff] (!%p1819_p11)  ;;  %v1441_v53 = vld [vmem:[%s2892_s0 + $0xa8] sm:$0xff] (!%p1819_p11) }
 0x295   : > { %v1178_v27 = vadd.f32 %v1047_v25, %v729_v21  ;;  %v1210_v28 = vadd.f32 %v1143_v26, %v761_v22  ;;  %v1049_v29 = vpop.f32.mrb[31].mxu0  ;;  %v1145_v30 = vpop.f32.mrb[31].mxu1  ;;  %v1433_v21 = vld [vmem:[%s2892_s0 + $0x68] sm:$0xff] (!%p1819_p11)  ;;  %v1434_v22 = vld [vmem:[%s2892_s0 + $0x70] sm:$0xff] (!%p1819_p11)  ;;  %1548 = vst [vmem:[%s2898_s4] sm:$0xff] (!%p1819_p11), %v1484_v9  ;;  %1549 = vst [vmem:[%s2898_s4 + $0x8] sm:$0xff] (!%p1819_p11), %v1485_v10  ;;  %v1365_v25 = vadd.f32 (!%p1819_p11), %v3102_v48, %v1289_v61 }
 0x296   : > { %v1179_v31 = vadd.f32 %v1049_v29, %v730_v23  ;;  %v1211_v32 = vadd.f32 %v1145_v30, %v762_v24  ;;  %v1435_v23 = vld [vmem:[%s2892_s0 + $0x78] sm:$0xff] (!%p1819_p11)  ;;  %1550 = vst [vmem:[%s2898_s4 + $0x10] sm:$0xff] (!%p1819_p11), %v1486_v11  ;;  %1551 = vst [vmem:[%s2898_s4 + $0x18] sm:$0xff] (!%p1819_p11), %v1487_v12  ;;  %v1364_v24 = vadd.f32 (!%p1819_p11), %v3100_v47, %v1288_v60  ;;  %v1297_v29 = vld [vmem:[#allocation2 + $0x88] sm:$0xff] (!%p1819_p11) }
 0x297   : > { %1242 = vst [vmem:[#allocation2 + $0xf0] sm:$0xff] %v1178_v27  ;;  %1274 = vst [vmem:[#allocation2 + $0x1f0] sm:$0xff] %v1210_v28  ;;  %v1366_v26 = vadd.f32 (!%p1819_p11), %v3100_v47, %v1290_v62  ;;  %v1367_v27 = vadd.f32 (!%p1819_p11), %v3102_v48, %v1291_v6  ;;  %v1296_v28 = vld [vmem:[#allocation2 + $0x80] sm:$0xff] (!%p1819_p11)  ;;  %v1298_v30 = vld [vmem:[#allocation2 + $0x90] sm:$0xff] (!%p1819_p11)  ;;  %v1371_v34 = vadd.f32 (!%p1819_p11), %v3102_v48, %v1295_v16 }
 0x298   : > { %1243 = vst [vmem:[#allocation2 + $0xf8] sm:$0xff] %v1179_v31  ;;  %1275 = vst [vmem:[#allocation2 + $0x1f8] sm:$0xff] %v1211_v32  ;;  %v1368_v31 = vadd.f32 (!%p1819_p11), %v3100_v47, %v1292_v8  ;;  %v1369_v32 = vadd.f32 (!%p1819_p11), %v3102_v48, %v1293_v14  ;;  %v1492_v40 = vadd.f32 (!%p1819_p11), %v1428_v3, %v1364_v24  ;;  %v1302_v54 = vld [vmem:[#allocation2 + $0xb0] sm:$0xff] (!%p1819_p11)  ;;  %v1303_v55 = vld [vmem:[#allocation2 + $0xb8] sm:$0xff] (!%p1819_p11) }
 0x299   : > { %1552 = vst [vmem:[%s2898_s4 + $0x20] sm:$0xff] %v1488_v17  ;;  %1553 = vst [vmem:[%s2898_s4 + $0x28] sm:$0xff] %v1489_v18  ;;  %v1493_v41 = vadd.f32 %v1429_v4, %v1365_v25  ;;  %v1494_v42 = vadd.f32 %v1430_v5, %v1366_v26  ;;  %v1495_v43 = vadd.f32 %v1431_v7, %v1367_v27  ;;  %v1442_v60 = vld [vmem:[%s2892_s0 + $0xb0] sm:$0xff]  ;;  %v1443_v61 = vld [vmem:[%s2892_s0 + $0xb8] sm:$0xff] }
 0x29a   : > { %1554 = vst [vmem:[%s2898_s4 + $0x30] sm:$0xff] %v1490_v19  ;;  %1555 = vst [vmem:[%s2898_s4 + $0x38] sm:$0xff] %v1491_v20  ;;  %v1496_v49 = vadd.f32 %v1432_v13, %v1368_v31  ;;  %v1497_v50 = vadd.f32 %v1433_v21, %v1369_v32  ;;  %v1498_v51 = vadd.f32 %v1434_v22, %v1370_v33  ;;  %v1304_v62 = vld [vmem:[#allocation2 + $0xc0] sm:$0xff]  ;;  %v1305_v4 = vld [vmem:[#allocation2 + $0xc8] sm:$0xff] }
 0x29b   : > { %v1499_v52 = vadd.f32 %v1435_v23, %v1371_v34  ;;  %1556 = vst [vmem:[%s2898_s4 + $0x40] sm:$0xff] %v1492_v40  ;;  %1557 = vst [vmem:[%s2898_s4 + $0x48] sm:$0xff] %v1493_v41  ;;  %v1372_v56 = vadd.f32 %v3100_v47, %v1296_v28  ;;  %v1373_v57 = vadd.f32 %v3102_v48, %v1297_v29  ;;  %v1444_v3 = vld [vmem:[%s2892_s0 + $0xc0] sm:$0xff]  ;;  %v1445_v5 = vld [vmem:[%s2892_s0 + $0xc8] sm:$0xff] }
 0x29c   : > { %1558 = vst [vmem:[%s2898_s4 + $0x50] sm:$0xff] %v1494_v42  ;;  %1559 = vst [vmem:[%s2898_s4 + $0x58] sm:$0xff] %v1495_v43  ;;  %v1374_v58 = vadd.f32 %v3100_v47, %v1298_v30  ;;  %v1376_v63 = vadd.f32 %v3100_v47, %v1300_v44  ;;  %v1377_v0 = vadd.f32 %v3102_v48, %v1301_v46  ;;  %v1306_v6 = vld [vmem:[#allocation2 + $0xd0] sm:$0xff]  ;;  %v1307_v12 = vld [vmem:[#allocation2 + $0xd8] sm:$0xff] }
 0x29d   : > { %1560 = vst [vmem:[%s2898_s4 + $0x60] sm:$0xff] %v1496_v49  ;;  %1561 = vst [vmem:[%s2898_s4 + $0x68] sm:$0xff] %v1497_v50  ;;  %v1378_v1 = vadd.f32 %v3100_v47, %v1302_v54  ;;  %v1379_v2 = vadd.f32 %v3102_v48, %v1303_v55  ;;  %v1500_v7 = vadd.f32 %v1436_v35, %v1372_v56  ;;  %v1446_v11 = vld [vmem:[%s2892_s0 + $0xd0] sm:$0xff]  ;;  %v1447_v13 = vld [vmem:[%s2892_s0 + $0xd8] sm:$0xff] }
 0x29e   : > { %1562 = vst [vmem:[%s2898_s4 + $0x70] sm:$0xff] %v1498_v51  ;;  %1563 = vst [vmem:[%s2898_s4 + $0x78] sm:$0xff] %v1499_v52  ;;  %v1501_v8 = vadd.f32 %v1437_v36, %v1373_v57  ;;  %v1502_v9 = vadd.f32 %v1438_v37, %v1374_v58  ;;  %v1503_v10 = vadd.f32 %v1439_v39, %v1375_v59  ;;  %v1308_v18 = vld [vmem:[#allocation2 + $0xe0] sm:$0xff]  ;;  %v1309_v20 = vld [vmem:[#allocation2 + $0xe8] sm:$0xff] }
 0x29f   : > { %v1504_v14 = vadd.f32 %v1440_v45, %v1376_v63  ;;  %v1505_v15 = vadd.f32 %v1441_v53, %v1377_v0  ;;  %v1506_v16 = vadd.f32 %v1442_v60, %v1378_v1  ;;  %v1507_v17 = vadd.f32 %v1443_v61, %v1379_v2  ;;  %v1448_v19 = vld [vmem:[%s2892_s0 + $0xe0] sm:$0xff]  ;;  %1564 = vst [vmem:[%s2898_s4 + $0x80] sm:$0xff] %v1500_v7  ;;  %v1449_v25 = vld [vmem:[%s2892_s0 + $0xe8] sm:$0xff]  ;;  %v1450_v27 = vld [vmem:[%s2892_s0 + $0xf0] sm:$0xff] }
 0x2a0   : > { %1565 = vst [vmem:[%s2898_s4 + $0x88] sm:$0xff] %v1501_v8  ;;  %1566 = vst [vmem:[%s2898_s4 + $0x90] sm:$0xff] %v1502_v9  ;;  %v1380_v21 = vadd.f32 %v3100_v47, %v1304_v62  ;;  %v1381_v22 = vadd.f32 %v3102_v48, %v1305_v4  ;;  %v1382_v23 = vadd.f32 %v3100_v47, %v1306_v6  ;;  %v1310_v26 = vld [vmem:[#allocation2 + $0xf0] sm:$0xff]  ;;  %v1311_v31 = vld [vmem:[#allocation2 + $0xf8] sm:$0xff] }
 0x2a1   : > { %1567 = vst [vmem:[%s2898_s4 + $0x98] sm:$0xff] %v1503_v10  ;;  %v1383_v24 = vadd.f32 %v3102_v48, %v1307_v12  ;;  %1568 = vst [vmem:[%s2898_s4 + $0xa0] sm:$0xff] %v1504_v14  ;;  %v1384_v28 = vadd.f32 %v3100_v47, %v1308_v18  ;;  %v1385_v29 = vadd.f32 %v3102_v48, %v1309_v20  ;;  %v1451_v32 = vld [vmem:[%s2892_s0 + $0xf8] sm:$0xff]  ;;  %v1452_v38 = vld [vmem:[%s2892_s0 + $0x100] sm:$0xff] }
 0x2a2   : > { %1569 = vst [vmem:[%s2898_s4 + $0xa8] sm:$0xff] %v1505_v15  ;;  %1570 = vst [vmem:[%s2898_s4 + $0xb0] sm:$0xff] %v1506_v16  ;;  %v1386_v30 = vadd.f32 %v3100_v47, %v1310_v26  ;;  %v1312_v33 = vld [vmem:[#allocation2 + $0x100] sm:$0xff]  ;;  %v1508_v34 = vadd.f32 %v1444_v3, %v1380_v21  ;;  %v1509_v35 = vadd.f32 %v1445_v5, %v1381_v22  ;;  %v1313_v39 = vld [vmem:[#allocation2 + $0x108] sm:$0xff] }
 0x2a3   : > { %1571 = vst [vmem:[%s2898_s4 + $0xb8] sm:$0xff] %v1507_v17  ;;  %v1510_v36 = vadd.f32 %v1446_v11, %v1382_v23  ;;  %v1511_v37 = vadd.f32 %v1447_v13, %v1383_v24  ;;  %v1453_v40 = vld [vmem:[%s2892_s0 + $0x108] sm:$0xff]  ;;  %v1512_v41 = vadd.f32 %v1448_v19, %v1384_v28  ;;  %v1513_v42 = vadd.f32 %v1449_v25, %v1385_v29  ;;  %v1454_v46 = vld [vmem:[%s2892_s0 + $0x110] sm:$0xff]  ;;  %v1455_v54 = vld [vmem:[%s2892_s0 + $0x118] sm:$0xff] }
 0x2a4   : > { %v1514_v43 = vadd.f32 %v1450_v27, %v1386_v30  ;;  %v1387_v44 = vadd.f32 %v3102_v48, %v1311_v31  ;;  %v1314_v45 = vld [vmem:[#allocation2 + $0x110] sm:$0xff]  ;;  %v1315_v49 = vld [vmem:[#allocation2 + $0x118] sm:$0xff]  ;;  %1572 = vst [vmem:[%s2898_s4 + $0xc0] sm:$0xff] %v1508_v34  ;;  %1573 = vst [vmem:[%s2898_s4 + $0xc8] sm:$0xff] %v1509_v35  ;;  %v1388_v50 = vadd.f32 %v3100_v47, %v1312_v33 }
 0x2a5   : > { %1574 = vst [vmem:[%s2898_s4 + $0xd0] sm:$0xff] %v1510_v36  ;;  %1575 = vst [vmem:[%s2898_s4 + $0xd8] sm:$0xff] %v1511_v37  ;;  %v1389_v51 = vadd.f32 %v3102_v48, %v1313_v39  ;;  %v1390_v52 = vadd.f32 %v3100_v47, %v1314_v45  ;;  %v1391_v53 = vadd.f32 %v3102_v48, %v1315_v49  ;;  %v1316_v55 = vld [vmem:[#allocation2 + $0x120] sm:$0xff]  ;;  %v1317_v59 = vld [vmem:[#allocation2 + $0x128] sm:$0xff] }
 0x2a6   : > { %v1456_v56 = vld [vmem:[%s2892_s0 + $0x120] sm:$0xff]  ;;  %1576 = vst [vmem:[%s2898_s4 + $0xe0] sm:$0xff] %v1512_v41  ;;  %1577 = vst [vmem:[%s2898_s4 + $0xe8] sm:$0xff] %v1513_v42  ;;  %v1515_v57 = vadd.f32 %v1451_v32, %v1387_v44  ;;  %v1392_v58 = vadd.f32 %v3100_v47, %v1316_v55  ;;  %v1457_v60 = vld [vmem:[%s2892_s0 + $0x128] sm:$0xff]  ;;  %v1516_v62 = vadd.f32 %v1452_v38, %v1388_v50 }
 0x2a7   : > { %1578 = vst [vmem:[%s2898_s4 + $0xf0] sm:$0xff] %v1514_v43  ;;  %v1318_v61 = vld [vmem:[#allocation2 + $0x130] sm:$0xff]  ;;  %v1517_v63 = vadd.f32 %v1453_v40, %v1389_v51  ;;  %v1518_v0 = vadd.f32 %v1454_v46, %v1390_v52  ;;  %v1519_v1 = vadd.f32 %v1455_v54, %v1391_v53  ;;  %v1319_v3 = vld [vmem:[#allocation2 + $0x138] sm:$0xff]  ;;  %v1393_v6 = vadd.f32 %v3102_v48, %v1317_v59  ;;  %v1320_v9 = vld [vmem:[#allocation2 + $0x140] sm:$0xff] }
 0x2a8   : > { %v1458_v2 = vld [vmem:[%s2892_s0 + $0x130] sm:$0xff]  ;;  %v1459_v4 = vld [vmem:[%s2892_s0 + $0x138] sm:$0xff]  ;;  %1579 = vst [vmem:[%s2898_s4 + $0xf8] sm:$0xff] %v1515_v57  ;;  %v1520_v5 = vadd.f32 %v1456_v56, %v1392_v58  ;;  %v1394_v7 = vadd.f32 %v3100_v47, %v1318_v61  ;;  %v1395_v8 = vadd.f32 %v3102_v48, %v1319_v3  ;;  %v1460_v10 = vld [vmem:[%s2892_s0 + $0x140] sm:$0xff]  ;;  %v1396_v12 = vadd.f32 %v3100_v47, %v1320_v9 }
 0x2a9   : > { %v1321_v11 = vld [vmem:[#allocation2 + $0x148] sm:$0xff]  ;;  %1580 = vst [vmem:[%s2898_s4 + $0x100] sm:$0xff] %v1516_v62  ;;  %1581 = vst [vmem:[%s2898_s4 + $0x108] sm:$0xff] %v1517_v63  ;;  %v1322_v15 = vld [vmem:[#allocation2 + $0x150] sm:$0xff]  ;;  %v1521_v17 = vadd.f32 %v1457_v60, %v1393_v6 }
 0x2aa   : > { %1582 = vst [vmem:[%s2898_s4 + $0x110] sm:$0xff] %v1518_v0  ;;  %1583 = vst [vmem:[%s2898_s4 + $0x118] sm:$0xff] %v1519_v1  ;;  %v1397_v13 = vadd.f32 %v3102_v48, %v1321_v11  ;;  %v1461_v14 = vld [vmem:[%s2892_s0 + $0x148] sm:$0xff]  ;;  %v1462_v16 = vld [vmem:[%s2892_s0 + $0x150] sm:$0xff]  ;;  %v1522_v18 = vadd.f32 %v1458_v2, %v1394_v7  ;;  %v1523_v19 = vadd.f32 %v1459_v4, %v1395_v8 }
 0x2ab   : > { %1584 = vst [vmem:[%s2898_s4 + $0x120] sm:$0xff] %v1520_v5  ;;  %v1398_v20 = vadd.f32 %v3100_v47, %v1322_v15  ;;  %v1323_v21 = vld [vmem:[#allocation2 + $0x158] sm:$0xff]  ;;  %v1324_v23 = vld [vmem:[#allocation2 + $0x160] sm:$0xff]  ;;  %v1524_v24 = vadd.f32 %v1460_v10, %v1396_v12  ;;  %v1325_v29 = vld [vmem:[#allocation2 + $0x168] sm:$0xff] }
 0x2ac   : > { %v1463_v22 = vld [vmem:[%s2892_s0 + $0x158] sm:$0xff]  ;;  %v1525_v25 = vadd.f32 %v1461_v14, %v1397_v13  ;;  %v1399_v26 = vadd.f32 %v3102_v48, %v1323_v21  ;;  %v1400_v27 = vadd.f32 %v3100_v47, %v1324_v23  ;;  %v1464_v28 = vld [vmem:[%s2892_s0 + $0x160] sm:$0xff]  ;;  %v1465_v30 = vld [vmem:[%s2892_s0 + $0x168] sm:$0xff]  ;;  %1585 = vst [vmem:[%s2898_s4 + $0x128] sm:$0xff] %v1521_v17  ;;  %v1401_v32 = vadd.f32 %v3102_v48, %v1325_v29 }
 0x2ad   : > { %1586 = vst [vmem:[%s2898_s4 + $0x130] sm:$0xff] %v1522_v18  ;;  %1587 = vst [vmem:[%s2898_s4 + $0x138] sm:$0xff] %v1523_v19  ;;  %v1526_v31 = vadd.f32 %v1462_v16, %v1398_v20  ;;  %v1326_v33 = vld [vmem:[#allocation2 + $0x170] sm:$0xff]  ;;  %v1327_v35 = vld [vmem:[#allocation2 + $0x178] sm:$0xff] }
 0x2ae   : > { %v1466_v34 = vld [vmem:[%s2892_s0 + $0x170] sm:$0xff]  ;;  %1588 = vst [vmem:[%s2898_s4 + $0x140] sm:$0xff] %v1524_v24  ;;  %1589 = vst [vmem:[%s2898_s4 + $0x148] sm:$0xff] %v1525_v25  ;;  %v1527_v36 = vadd.f32 %v1463_v22, %v1399_v26  ;;  %v1528_v37 = vadd.f32 %v1464_v28, %v1400_v27  ;;  %v1402_v38 = vadd.f32 %v3100_v47, %v1326_v33  ;;  %v1467_v40 = vld [vmem:[%s2892_s0 + $0x178] sm:$0xff] }
 0x2af   : > { %v1403_v39 = vadd.f32 %v3102_v48, %v1327_v35  ;;  %v1328_v41 = vld [vmem:[#allocation2 + $0x180] sm:$0xff]  ;;  %1590 = vst [vmem:[%s2898_s4 + $0x150] sm:$0xff] %v1526_v31  ;;  %v1529_v43 = vadd.f32 %v1465_v30, %v1401_v32  ;;  %v1329_v45 = vld [vmem:[#allocation2 + $0x188] sm:$0xff]  ;;  %v1330_v49 = vld [vmem:[#allocation2 + $0x190] sm:$0xff] }
 0x2b0   : > { %v1468_v42 = vld [vmem:[%s2892_s0 + $0x180] sm:$0xff]  ;;  %v1404_v44 = vadd.f32 %v3100_v47, %v1328_v41  ;;  %v1469_v46 = vld [vmem:[%s2892_s0 + $0x188] sm:$0xff]  ;;  %1591 = vst [vmem:[%s2898_s4 + $0x158] sm:$0xff] %v1527_v36  ;;  %1592 = vst [vmem:[%s2898_s4 + $0x160] sm:$0xff] %v1528_v37  ;;  %v1530_v50 = vadd.f32 %v1466_v34, %v1402_v38  ;;  %v1405_v52 = vadd.f32 %v3102_v48, %v1329_v45 }
 0x2b1   : > { %v1531_v51 = vadd.f32 %v1467_v40, %v1403_v39  ;;  %v1406_v53 = vadd.f32 %v3100_v47, %v1330_v49  ;;  %v1470_v54 = vld [vmem:[%s2892_s0 + $0x190] sm:$0xff]  ;;  %v1471_v56 = vld [vmem:[%s2892_s0 + $0x198] sm:$0xff]  ;;  %1593 = vst [vmem:[%s2898_s4 + $0x168] sm:$0xff] %v1529_v43  ;;  %v1472_v60 = vld [vmem:[%s2892_s0 + $0x1a0] sm:$0xff] }
 0x2b2   : > { %v1331_v55 = vld [vmem:[#allocation2 + $0x198] sm:$0xff]  ;;  %v1532_v57 = vadd.f32 %v1468_v42, %v1404_v44  ;;  %v1332_v59 = vld [vmem:[#allocation2 + $0x1a0] sm:$0xff]  ;;  %v1333_v61 = vld [vmem:[#allocation2 + $0x1a8] sm:$0xff]  ;;  %1594 = vst [vmem:[%s2898_s4 + $0x170] sm:$0xff] %v1530_v50  ;;  %v1533_v62 = vadd.f32 %v1469_v46, %v1405_v52 }
 0x2b3   : > { %v1407_v58 = vadd.f32 %v3102_v48, %v1331_v55  ;;  %1595 = vst [vmem:[%s2898_s4 + $0x178] sm:$0xff] %v1531_v51  ;;  %v1534_v63 = vadd.f32 %v1470_v54, %v1406_v53  ;;  %v1408_v0 = vadd.f32 %v3100_v47, %v1332_v59  ;;  %v1409_v1 = vadd.f32 %v3102_v48, %v1333_v61  ;;  %v1473_v2 = vld [vmem:[%s2892_s0 + $0x1a8] sm:$0xff]  ;;  %v1474_v4 = vld [vmem:[%s2892_s0 + $0x1b0] sm:$0xff]  ;;  %v1475_v8 = vld [vmem:[%s2892_s0 + $0x1b8] sm:$0xff] }
 0x2b4   : > { %v1334_v3 = vld [vmem:[#allocation2 + $0x1b0] sm:$0xff]  ;;  %1596 = vst [vmem:[%s2898_s4 + $0x180] sm:$0xff] %v1532_v57  ;;  %v1335_v7 = vld [vmem:[#allocation2 + $0x1b8] sm:$0xff]  ;;  %v1336_v9 = vld [vmem:[#allocation2 + $0x1c0] sm:$0xff] }
 0x2b5   : > { %v1535_v5 = vadd.f32 %v1471_v56, %v1407_v58  ;;  %v1410_v6 = vadd.f32 %v3100_v47, %v1334_v3  ;;  %1597 = vst [vmem:[%s2898_s4 + $0x188] sm:$0xff] %v1533_v62  ;;  %1598 = vst [vmem:[%s2898_s4 + $0x190] sm:$0xff] %v1534_v63  ;;  %v1536_v10 = vadd.f32 %v1472_v60, %v1408_v0  ;;  %v1476_v14 = vld [vmem:[%s2892_s0 + $0x1c0] sm:$0xff]  ;;  %v1477_v16 = vld [vmem:[%s2892_s0 + $0x1c8] sm:$0xff] }
 0x2b6   : > { %v1537_v11 = vadd.f32 %v1473_v2, %v1409_v1  ;;  %v1411_v12 = vadd.f32 %v3102_v48, %v1335_v7  ;;  %v1412_v13 = vadd.f32 %v3100_v47, %v1336_v9  ;;  %v1337_v15 = vld [vmem:[#allocation2 + $0x1c8] sm:$0xff]  ;;  %v1338_v19 = vld [vmem:[#allocation2 + $0x1d0] sm:$0xff]  ;;  %v1339_v21 = vld [vmem:[#allocation2 + $0x1d8] sm:$0xff] }
 0x2b7   : > { %1599 = vst [vmem:[%s2898_s4 + $0x198] sm:$0xff] %v1535_v5  ;;  %v1538_v17 = vadd.f32 %v1474_v4, %v1410_v6  ;;  %v1413_v18 = vadd.f32 %v3102_v48, %v1337_v15  ;;  %v1478_v20 = vld [vmem:[%s2892_s0 + $0x1d0] sm:$0xff]  ;;  %1600 = vst [vmem:[%s2898_s4 + $0x1a0] sm:$0xff] %v1536_v10  ;;  %v1414_v24 = vadd.f32 %v3100_v47, %v1338_v19  ;;  %v1479_v26 = vld [vmem:[%s2892_s0 + $0x1d8] sm:$0xff] }
 0x2b8   : > { %1601 = vst [vmem:[%s2898_s4 + $0x1a8] sm:$0xff] %v1537_v11  ;;  %v1539_v22 = vadd.f32 %v1475_v8, %v1411_v12  ;;  %v1540_v23 = vadd.f32 %v1476_v14, %v1412_v13  ;;  %v1415_v25 = vadd.f32 %v3102_v48, %v1339_v21  ;;  %v1340_v27 = vld [vmem:[#allocation2 + $0x1e0] sm:$0xff]  ;;  %v1341_v31 = vld [vmem:[#allocation2 + $0x1e8] sm:$0xff]  ;;  %v1342_v33 = vld [vmem:[#allocation2 + $0x1f0] sm:$0xff] }
 0x2b9   : > { %v1480_v28 = vld [vmem:[%s2892_s0 + $0x1e0] sm:$0xff]  ;;  %1602 = vst [vmem:[%s2898_s4 + $0x1b0] sm:$0xff] %v1538_v17  ;;  %v1541_v29 = vadd.f32 %v1477_v16, %v1413_v18  ;;  %v1416_v30 = vadd.f32 %v3100_v47, %v1340_v27  ;;  %v1481_v32 = vld [vmem:[%s2892_s0 + $0x1e8] sm:$0xff]  ;;  %v1542_v34 = vadd.f32 %v1478_v20, %v1414_v24  ;;  %v1417_v36 = vadd.f32 %v3102_v48, %v1341_v31  ;;  %v1482_v38 = vld [vmem:[%s2892_s0 + $0x1f0] sm:$0xff] }
 0x2ba   : > { %1603 = vst [vmem:[%s2898_s4 + $0x1b8] sm:$0xff] %v1539_v22  ;;  %1604 = vst [vmem:[%s2898_s4 + $0x1c0] sm:$0xff] %v1540_v23  ;;  %v1543_v35 = vadd.f32 %v1479_v26, %v1415_v25  ;;  %v1418_v37 = vadd.f32 %v3100_v47, %v1342_v33  ;;  %v1343_v39 = vld [vmem:[#allocation2 + $0x1f8] sm:$0xff] }
 0x2bb   : > { %v1483_v40 = vld [vmem:[%s2892_s0 + $0x1f8] sm:$0xff]  ;;  %1605 = vst [vmem:[%s2898_s4 + $0x1c8] sm:$0xff] %v1541_v29  ;;  %v1544_v41 = vadd.f32 %v1480_v28, %v1416_v30  ;;  %v1419_v42 = vadd.f32 %v3102_v48, %v1343_v39  ;;  %1606 = vst [vmem:[%s2898_s4 + $0x1d0] sm:$0xff] %v1542_v34  ;;  %v1545_v43 = vadd.f32 %v1481_v32, %v1417_v36 }
 0x2bc   : > { %1607 = vst [vmem:[%s2898_s4 + $0x1d8] sm:$0xff] %v1543_v35  ;;  %v1546_v44 = vadd.f32 %v1482_v38, %v1418_v37 }
 0x2bd   : > { %1608 = vst [vmem:[%s2898_s4 + $0x1e0] sm:$0xff] %v1544_v41  ;;  %v1547_v45 = vadd.f32 %v1483_v40, %v1419_v42  ;;  %1609 = vst [vmem:[%s2898_s4 + $0x1e8] sm:$0xff] %v1545_v43 }
 0x2be   : > { %1610 = vst [vmem:[%s2898_s4 + $0x1f0] sm:$0xff] %v1546_v44 }
 0x2bf   : > { %1611 = vst [vmem:[%s2898_s4 + $0x1f8] sm:$0xff] %v1547_v45 }
 0x2c0 PF: > { %s3438_s27 = sld [smem:[#allocation17_spill]]  ;;  %s3439_s6 = sld [smem:[#allocation18_spill]] }
 0x2c1   : > { %s3440_s25 = sld [smem:[#allocation26_spill]]  ;;  %s1629_s8 = sshll.u32 %s2898_s4, 4  ;;  %s3295_s8 = int_to_ptr.vmem [resolvable:$true] %s1629_s8 }
 0x2c2   : > { %s3441_s18 = sld [smem:[#allocation29_spill]]  ;;  %s1613_s0 = scalar_lea.sflag [#allocation7], %s2888_s23 }
 0x2c3   : > { %s2138_s7 = scalar_lea.vmem %s3295_s8, 8192  ;;  %s2320_s12 = smov [#allocation10]  }
 0x2c4   : > { %p2139_p2 = scmp.ne.s32.totalorder %s3295_s8, %s2138_s7  ;;  %s2142_s4 = sshll.u32 %s2320_s12, 4  ;;  %s2143_s4 = int_to_ptr.vmem [resolvable:$false] %s2142_s4 }
 0x2c5   : > { %p2145_p13 = scmp.lt.s32.totalorder %s3295_s8, %s2143_s4 }
 0x2c6   : > { %s1822_s14 = sshll.u32 %s3438_s27, 1  ;;  %s1831_s11 = sshll.u32 %s3439_s6, 7 }
 0x2c7   : > { %s1626_s9 = sadd.s32 %s1831_s11, %s1822_s14  ;;  %p3443_p4 = scmp.ne.s32.totalorder %s3440_s25, 0 }
 0x2c8   : > { %s1824_s26 = sshll.u32 %s1626_s9, 7  ;;  %s3442_s10 = smov %s3441_s18 }
 0x2c9   : > { %s3300_s1 = scalar_lea.hbm %s3441_s18, %s1824_s26  ;;  %p2140_p6 = pnand %p2139_p2, %p3443_p4 }
 0x2ca   : > { %s2144_s27 = scalar_lea.vmem %s2143_s4, 16384 }
 0x2cb   : > { %p2141_p3 = pneg %p2140_p6  ;;  %p2146_p8 = scmp.lt.s32.totalorder %s2144_s27, %s2138_s7 }
 0x2cd   : > { %p2147_p12 = por %p2146_p8, %p2145_p13 }
 0x2cf   : > { %p2148_p9 = pnand %p2147_p12, %p2141_p3 }
 0x2d1   : > { %2151 = shalt.err (!%p2148_p9)
}
 0x2d2   : > { %s2152_s6 = scalar_lea.hbm %s3300_s1, 8192  ;;  %s2156_s9 = scalar_lea.hbm %s3442_s10, 32768 }
 0x2d3   : > { %p2153_p0 = scmp.ne.s32.totalorder %s3300_s1, %s2152_s6  ;;  %p2157_p7 = scmp.lt.u32.totalorder %s3300_s1, %s3442_s10 }
 0x2d4   : > { %p2158_p10 = scmp.lt.u32.totalorder %s2156_s9, %s2152_s6  ;;  %p2160_p2 = scmp.lt.u32.totalorder %s2152_s6, %s3300_s1 }
 0x2d5   : > { %p2154_p5 = pnand %p2153_p0, %p3443_p4 }
 0x2d6   : > { %p2159_p11 = por %p2158_p10, %p2157_p7 }
 0x2d7   : > { %p2155_p1 = pneg %p2154_p5 }
 0x2d8   : > { %p2161_p6 = por %p2160_p2, %p2159_p11 }
 0x2da   : > { %p2162_p3 = pnand %p2161_p6, %p2155_p1 }
 0x2dc   : > { %2165 = shalt.err (!%p2162_p3)
}
 0x2dd   : > { %s2321_s13 = smov 256   ;;  %s2322_s18 = smov 512  }
 0x2de   : > { %s2323_s7 = smov 16  }
 0x2df   : > { %1932 = dma.vmem_to_hbm [thread:$0]  (%p3443_p4), %s3295_s8, 8192, %s3300_s1, %s1613_s0, %s2321_s13, %s2322_s18, %s2323_s7  }
 0x2e0 PF: > { %s3444_s12 = sld [smem:[#allocation14_spill]]  ;;  %p1938_p13 = scmp.ge.s32.totalorder %s2312_s5, 2 }
 0x2e1   : > { %p3445_p8 = scmp.ne.s32.totalorder %s3429_s21, 0 }
 0x2e3   : > { %p1935_p12 = pnand %p1938_p13, %p3445_p8 }
 0x2e6   : > { %s1644_s4 = sand.u32 1, %s3444_s12  }
 0x2e7   : > { %s1645_s27 = scalar_lea.sflag [#allocation7], %s1644_s4 }
 0x2e8   : > { %2243 = dma.done.wait (!%p1935_p12), %s1645_s27, 8192  }
 0x2e9   : > { %2245 = vsyncadd (!%p1935_p12), %s1645_s27, 4294959104  ;;  %s23_s5 = sadd.s32 1, %s2312_s5   ;;  %s3447_s23 = sld [smem:[#allocation25_spill]] }
 0x2ea   : > { %p3331_p9 = scmp.ge.s32.totalorder %s23_s5, 10   ;;  %s3448_s25 = sld [smem:[#allocation23_spill]] }
 0x2eb   : > { %s3449_s8 = sld [smem:[#allocation22_spill]]  ;;  %s3450_s1 = sld [smem:[#allocation24_spill]] }
 0x2ec   : > { %s3451_s0 = sld [smem:[#allocation19_spill]]  ;;  %s3452_s14 = sld [smem:[#allocation20_spill]] }
 0x2ed   : > { %s3453_s11 = sld [smem:[#allocation21_spill]]  ;;  %s3454_s15 = smov %s2252_s16 }
 0x2ee   : > { %s3455_s16 = smov %s2256_s17  ;;  %s3457_s18 = smov %s2264_s19 }
 0x2ef   : > { %s3456_s17 = smov %s3447_s23  ;;  %s3458_s19 = smov %s2268_s20 }
 0x2f0   : > { %s3459_s20 = smov %s3448_s25  ;;  %s3460_s21 = smov %s2276_s22 }
 0x2f1   : > { %s3461_s22 = smov %s3449_s8  ;;  %s3462_s23 = smov %s2284_s24 }
 0x2f2   : > { %s3463_s24 = smov %s3450_s1  ;;  %s3464_s25 = smov %s2300_s28 }
 0x2f3   : > { %s3465_s26 = smov %s2304_s29  ;;  %s3466_s27 = smov %s2308_s30 }
 0x2f4   : > { %s3467_s28 = smov %s3451_s0  ;;  %s3468_s29 = smov %s3452_s14 }
 0x2f5   : > { %s3469_s30 = smov %s3453_s11  ;;  %22 = sbr.rel (!%p3331_p9) target bundleno = 18 (0x12), region = 164 }
 0x2fc   :  { %1650 = vsyncpa [#allocation6], 1 }
 0x2fd   :  { %1652 = vsyncpa [#allocation6 + $0x1], 1 }
 0x2fe   :  { %1653 = vsyncpa [#allocation9], 1 }
 0x2ff   :  { %1655 = vsyncpa [#allocation9 + $0x1], 1 }
 0x300   :  { %1656 = vsyncpa [#allocation7], 1 }
 0x301   :  { %1658 = vsyncpa [#allocation7 + $0x1], 1 }

</bundles_post_ra>
